<compile_context>
chip_gen: v7x
topology: tpu7x:2x2x1
jax: 0.10.0
libtpu: 0.0.40
codegen_flags: <defaults>
</compile_context>

<pallas_src>
import functools
import math

import numpy as np
import jax
import jax.numpy as jnp
from jax import lax
from jax.experimental import pallas as pl
from jax.experimental.pallas import tpu as pltpu

OUT_NEURONS = 101          # fixed by the module
BN_EPS = 1e-5
LANE = 128
NEG_BIG = -1e30            # finite "-inf": exp() underflows to 0; NEG_BIG * 0.0 == 0.0
                           # exactly, so zero W3 pad rows keep the group head exact.


def _round_up(n, m):
    return ((n + m - 1) // m) * m


def _pick_tk(feat):
    # Big K tiles to amortize per-step overhead; exact division so there is no
    # edge-block masking; force >=2 steps when possible to exercise the accumulator.
    for tk in (2048, 1024, 512, 256, 128):
        if feat % tk == 0 and feat // tk > 1:
            return tk
    return feat


# ---------------------------------------------------------------------------
# One-time parameter preparation (NOT in the per-call jitted path).
#  * Fold BatchNorm running stats into W1 / b1.
#  * Transpose weights to (in, out), zero-pad heads to 128 lanes.
#  * b2 pad lanes = NEG_BIG  -> padded logits are exactly NEG_BIG (no in-kernel mask).
#  * INVARIANT: W3's pad rows (lanes >= 101 of the logits) must be exactly 0.
#  * Cast the big streamed weight W1 to bf16 (f32 accumulation in the kernel).
# ---------------------------------------------------------------------------
def prepare_params(p, spatial, age_group):
    hw = spatial * spatial
    scale_c = p['bn_gamma'] * lax.rsqrt(p['bn_var'] + BN_EPS)
    bias_c = p['bn_beta'] - p['bn_mean'] * scale_c
    scale_f = jnp.repeat(scale_c, hw)                       # (feat,)
    bias_f = jnp.repeat(bias_c, hw)                         # (feat,)

    w1t = p['w1'].T.astype(jnp.float32)                     # (feat, hidden)
    b1_fold = p['b1'] + bias_f @ w1t                        # (hidden,)  f32
    w1t_fold = (w1t * scale_f[:, None]).astype(jnp.bfloat16)

    hidden = w1t.shape[1]
    w2t = jnp.zeros((hidden, LANE), jnp.float32).at[:, :OUT_NEURONS].set(p['w2'].T)
    b2 = jnp.full((1, LANE), NEG_BIG, jnp.float32).at[0, :OUT_NEURONS].set(p['b2'])
    w3t = jnp.zeros((LANE, LANE), jnp.float32).at[:OUT_NEURONS, :age_group].set(p['w3'].T)
    b3 = jnp.zeros((1, LANE), jnp.float32).at[0, :age_group].set(p['b3'])
    expect = jnp.zeros((1, LANE), jnp.float32).at[0, :OUT_NEURONS].set(
        jnp.arange(OUT_NEURONS, dtype=jnp.float32))

    return {'w1t': w1t_fold, 'b1': b1_fold[None, :].astype(jnp.float32),
            'w2t': w2t, 'b2': b2, 'w3t': w3t, 'b3': b3, 'expect': expect}


# ---------------------------------------------------------------------------
# Fused kernel: (BN-folded) Linear1 (K-blocked, bf16 MXU, f32 acc) -> ReLU
#               -> Linear2 -> {group head, softmax E[age]}
# ---------------------------------------------------------------------------
def _age_kernel(x_ref, w1_ref, b1_ref, w2_ref, b2_ref, w3_ref, b3_ref, exp_ref,
                age_ref, group_ref, acc_ref):
    k = pl.program_id(1)

    @pl.when(k == 0)
    def _init():
        acc_ref[...] = jnp.zeros_like(acc_ref)

    # K-blocked first matmul: bf16 operands, f32 accumulation on the MXU.
    acc_ref[...] += jnp.dot(x_ref[...], w1_ref[...],
                            preferred_element_type=jnp.float32)

    @pl.when(k == pl.num_programs(1) - 1)
    def _finalize():
        h = jnp.maximum(acc_ref[...] + b1_ref[...], 0.0)                  # (TB, H1)
        logits = (jnp.dot(h, w2_ref[...],
                          preferred_element_type=jnp.float32) + b2_ref[...])  # (TB,128)

        # Group head. Pad lanes of logits are NEG_BIG; W3 pad rows are 0 -> exact.
        group_ref[...] = (jnp.dot(logits, w3_ref[...],
                                  preferred_element_type=jnp.float32) + b3_ref[...])

        # Softmax expectation over 128 lanes: pad lanes underflow to exp()==0.
        m = jnp.max(logits, axis=-1, keepdims=True)
        e = jnp.exp(logits - m)
        num = jnp.sum(e * exp_ref[...], axis=-1, keepdims=True)
        den = jnp.sum(e, axis=-1, keepdims=True)
        age = num * pl.reciprocal(den, approx=True)                       # (TB, 1)
        age_ref[...] = jnp.broadcast_to(age, age_ref.shape)               # lane-dense


def age_estimation_forward(x, prep, age_group):
    N, C, H, W = x.shape
    feat = C * H * W
    hidden = prep['w1t'].shape[1]

    # Batch tiling: multiple of 16 sublanes (bf16 packing), up to 128 rows per step.
    tb = min(128, _round_up(N, 16))
    n_pad = _round_up(N, tb)
    tk = _pick_tk(feat)
    n_b, n_k = n_pad // tb, feat // tk

    x_flat = x.reshape(N, feat).astype(jnp.bfloat16)
    if n_pad != N:
        x_flat = jnp.pad(x_flat, ((0, n_pad - N), (0, 0)))

    const = lambda b, k: (0, 0)
    grid_spec = pltpu.PrefetchScalarGridSpec(
        num_scalar_prefetch=0,
        grid=(n_b, n_k),                                    # reduction axis last
        in_specs=[
            pl.BlockSpec((tb, tk), lambda b, k: (b, k)),    # x        (bf16)
            pl.BlockSpec((tk, hidden), lambda b, k: (k, 0)),  # W1 stream (bf16)
            pl.BlockSpec((1, hidden), const),               # b1 (folded)
            pl.BlockSpec((hidden, LANE), const),            # W2
            pl.BlockSpec((1, LANE), const),                 # b2 (pad = NEG_BIG)
            pl.BlockSpec((LANE, LANE), const),              # W3 (pad rows = 0)
            pl.BlockSpec((1, LANE), const),                 # b3
            pl.BlockSpec((1, LANE), const),                 # expectation
        ],
        out_specs=(pl.BlockSpec((tb, LANE), lambda b, k: (b, 0)),   # E[age] slab
                   pl.BlockSpec((tb, LANE), lambda b, k: (b, 0))),  # group (padded)
        scratch_shapes=[pltpu.VMEM((tb, hidden), jnp.float32)],     # f32 accumulator
    )

    age_pad, group_pad = pl.pallas_call(
        _age_kernel,
        out_shape=(jax.ShapeDtypeStruct((n_pad, LANE), jnp.float32),
                   jax.ShapeDtypeStruct((n_pad, LANE), jnp.float32)),
        grid_spec=grid_spec,
        # K-blocking keeps live VMEM to a few MiB, under every generation's default
        # scoped limit, so no vmem_limit_bytes override is needed.
        compiler_params=pltpu.CompilerParams(
            dimension_semantics=("parallel", "arbitrary")),
    )(x_flat, prep['w1t'], prep['b1'], prep['w2t'], prep['b2'],
      prep['w3t'], prep['b3'], prep['expect'])

    return age_pad[:N, 0], group_pad[:N, :age_group]


# ---------------------------------------------------------------------------
# Deterministic parameter init (matches the module's shapes).
# ---------------------------------------------------------------------------
def init_params(key, channels, spatial, hidden, age_group):
    feat = channels * spatial * spatial
    ks = jax.random.split(key, 10)
    return {
        'bn_gamma': 1.0 + 0.1 * jax.random.normal(ks[0], (channels,), jnp.float32),
        'bn_beta': 0.1 * jax.random.normal(ks[1], (channels,), jnp.float32),
        'bn_mean': 0.1 * jax.random.normal(ks[2], (channels,), jnp.float32),
        'bn_var': 0.9 + 0.2 * jax.random.uniform(ks[3], (channels,), jnp.float32),
        'w1': (1.0 / math.sqrt(feat)) *
              jax.random.normal(ks[4], (hidden, feat), jnp.float32),
        'b1': 0.1 * jax.random.normal(ks[5], (hidden,), jnp.float32),
        'w2': (1.0 / math.sqrt(hidden)) *
              jax.random.normal(ks[6], (OUT_NEURONS, hidden), jnp.float32),
        'b2': 0.1 * jax.random.normal(ks[7], (OUT_NEURONS,), jnp.float32),
        'w3': (1.0 / math.sqrt(OUT_NEURONS)) *
              jax.random.normal(ks[8], (age_group, OUT_NEURONS), jnp.float32),
        'b3': 0.1 * jax.random.normal(ks[9], (age_group,), jnp.float32),
    }


# ---------------------------------------------------------------------------
# Pure-JAX f32 reference (correctness check only).
# ---------------------------------------------------------------------------
def reference_forward(x, p):
    N, C, H, W = x.shape
    scale = p['bn_gamma'] / jnp.sqrt(p['bn_var'] + BN_EPS)
    bias = p['bn_beta'] - p['bn_mean'] * scale
    xb = x * scale[None, :, None, None] + bias[None, :, None, None]
    f = xb.reshape(N, -1)
    h = jnp.maximum(f @ p['w1'].T + p['b1'], 0.0)
    logits = h @ p['w2'].T + p['b2']
    x_group = logits @ p['w3'].T + p['b3']
    probs = jax.nn.softmax(logits, axis=1)
    x_age = (probs * jnp.arange(OUT_NEURONS, dtype=jnp.float32)[None, :]).sum(axis=1)
    return x_age, x_group


if __name__ == "__main__":
    key = jax.random.PRNGKey(0)
    kx, kp = jax.random.split(key)

    # Small shapes consistent with the module: 512 channels (fixed by BatchNorm2d(512)),
    # input_size=32 -> spatial = 32//16 = 2 -> feat = 2048, hidden 512, 101 bins, 7 groups.
    batch, channels, input_size, hidden, age_group = 2, 512, 32, 512, 7
    spatial = input_size // 16

    x = jax.random.normal(kx, (batch, channels, spatial, spatial), dtype=jnp.float32)
    params = init_params(kp, channels, spatial, hidden, age_group)

    # One-time weight layout / BN fold / bf16 cast (outside the per-call jitted path).
    prep = jax.tree_util.tree_map(jax.block_until_ready,
                                  prepare_params(params, spatial, age_group))

    fwd = jax.jit(functools.partial(age_estimation_forward, age_group=age_group))
    x_age, x_group = fwd(x, prep)
    jax.block_until_ready((x_age, x_group))

    ref_age, ref_group = reference_forward(x, params)
    # Tolerances account for the intentional bf16 cast of W1 / activations (f32 accum).
    np.testing.assert_allclose(np.asarray(x_age), np.asarray(ref_age),
                               rtol=2e-2, atol=5e-2)
    np.testing.assert_allclose(np.asarray(x_group), np.asarray(ref_group),
                               rtol=2e-2, atol=5e-2)

    print("KERNEL_OK")
</pallas_src>

<mosaic_0001>
module attributes {stable_mosaic.version = 11 : i64} {
  func.func @_age_kernel(%arg0: i32, %arg1: i32, %arg2: memref<16x1024xbf16, #tpu.memory_space<vmem>>, %arg3: memref<1024x512xbf16, #tpu.memory_space<vmem>>, %arg4: memref<1x512xf32, #tpu.memory_space<vmem>>, %arg5: memref<512x128xf32, #tpu.memory_space<vmem>>, %arg6: memref<1x128xf32, #tpu.memory_space<vmem>>, %arg7: memref<128x128xf32, #tpu.memory_space<vmem>>, %arg8: memref<1x128xf32, #tpu.memory_space<vmem>>, %arg9: memref<1x128xf32, #tpu.memory_space<vmem>>, %arg10: memref<16x128xf32, #tpu.memory_space<vmem>>, %arg11: memref<16x128xf32, #tpu.memory_space<vmem>>, %arg12: memref<16x512xf32, #tpu.memory_space<vmem>>) attributes {dimension_semantics = [#tpu.dimension_semantics<parallel>, #tpu.dimension_semantics<arbitrary>], iteration_bounds = array<i64: 1, 2>, scalar_prefetch = 0 : i64, scratch_operands = 1 : i64, tpu.core_type = #tpu.core_type<tc>, window_params = [{transform_indices = @transform_0, window_bounds = array<i64: 16, 1024>}, {transform_indices = @transform_1, window_bounds = array<i64: 1024, 512>}, {pipeline_mode = #tpu.pipeline_mode<synchronous>, transform_indices = @transform_2, window_bounds = array<i64: 1, 512>}, {pipeline_mode = #tpu.pipeline_mode<synchronous>, transform_indices = @transform_3, window_bounds = array<i64: 512, 128>}, {pipeline_mode = #tpu.pipeline_mode<synchronous>, transform_indices = @transform_4, window_bounds = array<i64: 1, 128>}, {pipeline_mode = #tpu.pipeline_mode<synchronous>, transform_indices = @transform_5, window_bounds = array<i64: 128, 128>}, {pipeline_mode = #tpu.pipeline_mode<synchronous>, transform_indices = @transform_6, window_bounds = array<i64: 1, 128>}, {pipeline_mode = #tpu.pipeline_mode<synchronous>, transform_indices = @transform_7, window_bounds = array<i64: 1, 128>}, {transform_indices = @transform_8, window_bounds = array<i64: 16, 128>}, {transform_indices = @transform_9, window_bounds = array<i64: 16, 128>}]} {
    %c0_i32 = arith.constant 0 : i32
    %0 = arith.cmpi eq, %arg1, %c0_i32 : i32
    %1 = arith.extui %0 : i1 to i32
    %c0_i32_0 = arith.constant 0 : i32
    %2 = arith.cmpi ne, %1, %c0_i32_0 : i32
    scf.if %2 {
      %cst_9 = arith.constant 0.000000e+00 : f32
      %12 = vector.broadcast %cst_9 : f32 to vector<16x512xf32>
      %c0_10 = arith.constant 0 : index
      %c0_11 = arith.constant 0 : index
      %13 = vector.load %arg12[%c0_10, %c0_11] : memref<16x512xf32, #tpu.memory_space<vmem>>, vector<16x512xf32>
      tpu.vector_store %arg12[%c0_10, %c0_11], %12 {strides = array<i32>} : memref<16x512xf32, #tpu.memory_space<vmem>>, vector<16x512xf32>,
    } else {
    }
    %c0 = arith.constant 0 : index
    %c0_1 = arith.constant 0 : index
    %3 = vector.load %arg12[%c0, %c0_1] : memref<16x512xf32, #tpu.memory_space<vmem>>, vector<16x512xf32>
    %c0_2 = arith.constant 0 : index
    %c0_3 = arith.constant 0 : index
    %4 = vector.load %arg2[%c0_2, %c0_3] : memref<16x1024xbf16, #tpu.memory_space<vmem>>, vector<16x1024xbf16>
    %c0_4 = arith.constant 0 : index
    %c0_5 = arith.constant 0 : index
    %5 = vector.load %arg3[%c0_4, %c0_5] : memref<1024x512xbf16, #tpu.memory_space<vmem>>, vector<1024x512xbf16>
    %cst = arith.constant dense<0.000000e+00> : vector<16x512xf32>
    %6 = tpu.matmul %4, %5, %cst {dimension_numbers = #tpu.dot_dimension_numbers<[1], [0], [0], [1], [0, 0, 1, 1], [], []>} : vector<16x1024xbf16>, vector<1024x512xbf16>, vector<16x512xf32> -> vector<16x512xf32>
    %7 = arith.addf %3, %6 : vector<16x512xf32>
    %c0_6 = arith.constant 0 : index
    %c0_7 = arith.constant 0 : index
    %8 = vector.load %arg12[%c0_6, %c0_7] : memref<16x512xf32, #tpu.memory_space<vmem>>, vector<16x512xf32>
    tpu.vector_store %arg12[%c0_6, %c0_7], %7 {strides = array<i32>} : memref<16x512xf32, #tpu.memory_space<vmem>>, vector<16x512xf32>,
    %c1_i32 = arith.constant 1 : i32
    %9 = arith.cmpi eq, %arg1, %c1_i32 : i32
    %10 = arith.extui %9 : i1 to i32
    %c0_i32_8 = arith.constant 0 : i32
    %11 = arith.cmpi ne, %10, %c0_i32_8 : i32
    scf.if %11 {
      %c0_9 = arith.constant 0 : index
      %c0_10 = arith.constant 0 : index
      %12 = vector.load %arg12[%c0_9, %c0_10] : memref<16x512xf32, #tpu.memory_space<vmem>>, vector<16x512xf32>
      %c0_11 = arith.constant 0 : index
      %c0_12 = arith.constant 0 : index
      %13 = vector.load %arg4[%c0_11, %c0_12] : memref<1x512xf32, #tpu.memory_space<vmem>>, vector<1x512xf32>
      %14 = vector.broadcast %13 : vector<1x512xf32> to vector<16x512xf32>
      %15 = arith.addf %12, %14 : vector<16x512xf32>
      %cst_13 = arith.constant 0.000000e+00 : f32
      %16 = vector.broadcast %cst_13 : f32 to vector<16x512xf32>
      %17 = arith.maximumf %15, %16 : vector<16x512xf32>
      %c0_14 = arith.constant 0 : index
      %c0_15 = arith.constant 0 : index
      %18 = vector.load %arg5[%c0_14, %c0_15] : memref<512x128xf32, #tpu.memory_space<vmem>>, vector<512x128xf32>
      %cst_16 = arith.constant dense<0.000000e+00> : vector<16x128xf32>
      %19 = tpu.matmul %17, %18, %cst_16 {dimension_numbers = #tpu.dot_dimension_numbers<[1], [0], [0], [1], [0, 0, 1, 1], [], []>} : vector<16x512xf32>, vector<512x128xf32>, vector<16x128xf32> -> vector<16x128xf32>
      %c0_17 = arith.constant 0 : index
      %c0_18 = arith.constant 0 : index
      %20 = vector.load %arg6[%c0_17, %c0_18] : memref<1x128xf32, #tpu.memory_space<vmem>>, vector<1x128xf32>
      %21 = vector.broadcast %20 : vector<1x128xf32> to vector<16x128xf32>
      %22 = arith.addf %19, %21 : vector<16x128xf32>
      %c0_19 = arith.constant 0 : index
      %c0_20 = arith.constant 0 : index
      %23 = vector.load %arg7[%c0_19, %c0_20] : memref<128x128xf32, #tpu.memory_space<vmem>>, vector<128x128xf32>
      %cst_21 = arith.constant dense<0.000000e+00> : vector<16x128xf32>
      %24 = tpu.matmul %22, %23, %cst_21 {dimension_numbers = #tpu.dot_dimension_numbers<[1], [0], [0], [1], [0, 0, 1, 1], [], []>} : vector<16x128xf32>, vector<128x128xf32>, vector<16x128xf32> -> vector<16x128xf32>
      %c0_22 = arith.constant 0 : index
      %c0_23 = arith.constant 0 : index
      %25 = vector.load %arg8[%c0_22, %c0_23] : memref<1x128xf32, #tpu.memory_space<vmem>>, vector<1x128xf32>
      %26 = vector.broadcast %25 : vector<1x128xf32> to vector<16x128xf32>
      %27 = arith.addf %24, %26 : vector<16x128xf32>
      %c0_24 = arith.constant 0 : index
      %c0_25 = arith.constant 0 : index
      %28 = vector.load %arg11[%c0_24, %c0_25] : memref<16x128xf32, #tpu.memory_space<vmem>>, vector<16x128xf32>
      tpu.vector_store %arg11[%c0_24, %c0_25], %27 {strides = array<i32>} : memref<16x128xf32, #tpu.memory_space<vmem>>, vector<16x128xf32>,
      %cst_26 = arith.constant dense<0xFF800000> : vector<16xf32>
      %29 = vector.multi_reduction <maximumf>, %22, %cst_26 [1] : vector<16x128xf32> to vector<16xf32>
      %30 = vector.shape_cast %29 : vector<16xf32> to vector<16x1xf32>
      %31 = vector.broadcast %30 : vector<16x1xf32> to vector<16x128xf32>
      %32 = arith.subf %22, %31 : vector<16x128xf32>
      %33 = math.exp %32 : vector<16x128xf32>
      %c0_27 = arith.constant 0 : index
      %c0_28 = arith.constant 0 : index
      %34 = vector.load %arg9[%c0_27, %c0_28] : memref<1x128xf32, #tpu.memory_space<vmem>>, vector<1x128xf32>
      %35 = vector.broadcast %34 : vector<1x128xf32> to vector<16x128xf32>
      %36 = arith.mulf %33, %35 : vector<16x128xf32>
      %cst_29 = arith.constant dense<0.000000e+00> : vector<16xf32>
      %37 = vector.multi_reduction <add>, %36, %cst_29 [1] : vector<16x128xf32> to vector<16xf32>
      %38 = vector.shape_cast %37 : vector<16xf32> to vector<16x1xf32>
      %cst_30 = arith.constant dense<0.000000e+00> : vector<16xf32>
      %39 = vector.multi_reduction <add>, %33, %cst_30 [1] : vector<16x128xf32> to vector<16xf32>
      %40 = vector.shape_cast %39 : vector<16xf32> to vector<16x1xf32>
      %41 = tpu.reciprocal %40 {approx = true} : vector<16x1xf32> -> vector<16x1xf32>
      %42 = arith.mulf %38, %41 : vector<16x1xf32>
      %43 = vector.shape_cast %42 : vector<16x1xf32> to vector<16x1xf32>
      %44 = vector.broadcast %43 : vector<16x1xf32> to vector<16x128xf32>
      %c0_31 = arith.constant 0 : index
      %c0_32 = arith.constant 0 : index
      %45 = vector.load %arg10[%c0_31, %c0_32] : memref<16x128xf32, #tpu.memory_space<vmem>>, vector<16x128xf32>
      tpu.vector_store %arg10[%c0_31, %c0_32], %44 {strides = array<i32>} : memref<16x128xf32, #tpu.memory_space<vmem>>, vector<16x128xf32>,
    } else {
    }
    return
  }
  func.func @transform_0(%arg0: i32, %arg1: i32) -> (i32, i32) {
    %c0_i32 = arith.constant 0 : i32
    return %arg0, %arg1 : i32, i32
  }
  func.func @transform_1(%arg0: i32, %arg1: i32) -> (i32, i32) {
    %c0_i32 = arith.constant 0 : i32
    %c0_i32_0 = arith.constant 0 : i32
    return %arg1, %c0_i32 : i32, i32
  }
  func.func @transform_2(%arg0: i32, %arg1: i32) -> (i32, i32) {
    %c0_i32 = arith.constant 0 : i32
    %c0_i32_0 = arith.constant 0 : i32
    %c0_i32_1 = arith.constant 0 : i32
    return %c0_i32, %c0_i32_0 : i32, i32
  }
  func.func @transform_3(%arg0: i32, %arg1: i32) -> (i32, i32) {
    %c0_i32 = arith.constant 0 : i32
    %c0_i32_0 = arith.constant 0 : i32
    %c0_i32_1 = arith.constant 0 : i32
    return %c0_i32, %c0_i32_0 : i32, i32
  }
  func.func @transform_4(%arg0: i32, %arg1: i32) -> (i32, i32) {
    %c0_i32 = arith.constant 0 : i32
    %c0_i32_0 = arith.constant 0 : i32
    %c0_i32_1 = arith.constant 0 : i32
    return %c0_i32, %c0_i32_0 : i32, i32
  }
  func.func @transform_5(%arg0: i32, %arg1: i32) -> (i32, i32) {
    %c0_i32 = arith.constant 0 : i32
    %c0_i32_0 = arith.constant 0 : i32
    %c0_i32_1 = arith.constant 0 : i32
    return %c0_i32, %c0_i32_0 : i32, i32
  }
  func.func @transform_6(%arg0: i32, %arg1: i32) -> (i32, i32) {
    %c0_i32 = arith.constant 0 : i32
    %c0_i32_0 = arith.constant 0 : i32
    %c0_i32_1 = arith.constant 0 : i32
    return %c0_i32, %c0_i32_0 : i32, i32
  }
  func.func @transform_7(%arg0: i32, %arg1: i32) -> (i32, i32) {
    %c0_i32 = arith.constant 0 : i32
    %c0_i32_0 = arith.constant 0 : i32
    %c0_i32_1 = arith.constant 0 : i32
    return %c0_i32, %c0_i32_0 : i32, i32
  }
  func.func @transform_8(%arg0: i32, %arg1: i32) -> (i32, i32) {
    %c0_i32 = arith.constant 0 : i32
    %c0_i32_0 = arith.constant 0 : i32
    return %arg0, %c0_i32 : i32, i32
  }
  func.func @transform_9(%arg0: i32, %arg1: i32) -> (i32, i32) {
    %c0_i32 = arith.constant 0 : i32
    %c0_i32_0 = arith.constant 0 : i32
    return %arg0, %c0_i32 : i32, i32
  }
}

</mosaic_0001>

<bundles_post_ra>
// kernel: age_estimation_forward.1
= control target key start
LH: loop header
LB: loop body
LE: loop exit
PB: predicated region body
PF: predicated region fallthrough
CT: control target
= control target key end

     0   :  { %s5033_s0 = inlined_call_operand.vmem [shape: bf16[16,2048], index: 0, kind: input, shape index: {}]   ;;  %s5034_s1 = inlined_call_operand.hbm [shape: bf16[2048,512], index: 1, kind: input, shape index: {}]   ;;  %s5035_s2 = inlined_call_operand.hbm [shape: f32[1,512], index: 2, kind: input, shape index: {}]   ;;  %s5036_s3 = inlined_call_operand.hbm [shape: f32[512,128], index: 3, kind: input, shape index: {}]   ;;  %s5037_s4 = inlined_call_operand.hbm [shape: f32[1,128], index: 4, kind: input, shape index: {}]   ;;  %s5038_s5 = inlined_call_operand.hbm [shape: f32[128,128], index: 5, kind: input, shape index: {}]   ;;  %s5039_s6 = inlined_call_operand.hbm [shape: f32[1,128], index: 6, kind: input, shape index: {}]   ;;  %s5040_s7 = inlined_call_operand.hbm [shape: f32[1,128], index: 7, kind: input, shape index: {}]   ;;  %s5041_s8 = inlined_call_operand.vmem [shape: f32[16,128], index: 8, kind: output, shape index: {0}]   ;;  %s5042_s9 = inlined_call_operand.vmem [shape: f32[16,128], index: 9, kind: output, shape index: {1}]  }
   0x1   :  { %5051 = sst [smem:[#allocation22_spill]] %s5035_s2 }
   0x2   :  { %5052 = sst [smem:[#allocation23_spill]] %s5037_s4 }
   0x3   :  { %5053 = sst [smem:[#allocation24_spill]] %s5039_s6 }
   0x4   :  { %5054 = sst [smem:[#allocation25_spill]] %s5041_s8 }
   0x5   :  { %5055 = sst [smem:[#allocation26_spill]] %s5042_s9 }
   0x6   :  { %15 = vsyncpa [#allocation5], 0 }
   0x7   :  { %17 = vsyncpa [#allocation5 + $0x1], 0 }
   0x8   :  { %18 = vsyncpa [#allocation7], 0 }
   0x9   :  { %19 = vsyncpa [#allocation10], 0 }
   0xa   :  { %20 = vsyncpa [#allocation13], 0  ;;  %s4454_s30 = smov 0   ;;  %s4456_s10 = smov 0  }
   0xb   :  { %s4458_s11 = smov 0   ;;  %s4460_s12 = smov 0  }
   0xc   :  { %s4462_s13 = smov 0   ;;  %s4464_s14 = smov 0  }
   0xd LB: > { %5056 = sst [smem:[#allocation19_spill]] %s4382_s12  ;;  %s3072_s15 = sadd.s32 4294967295, %s4390_s14   ;;  %s4390_s14 = sphi %s4464_s14, %s26_s14   ;;  %s4386_s13 = sphi %s4462_s13, %s5083_s13   ;;  %s4382_s12 = sphi %s4460_s12, %s5082_s12   ;;  %s4378_s11 = sphi %s4458_s11, %s5081_s11   ;;  %s4374_s10 = sphi %s4456_s10, %s5080_s10   ;;  %s4370_s30 = sphi %s4454_s30, %s5079_s30  }
   0xe   : > { %s35_s16 = sadd.s32 1, %s4386_s13  ;;  %s47_s17 = sadd.s32 1, %s4378_s11 }
   0xf   : > { %p36_p0 = scmp.ge.s32.totalorder %s35_s16, 2  ;;  %p54_p1 = scmp.ne.s32.totalorder %s4378_s11, %s4374_s10 }
  0x10   : > { %p55_p2 = scmp.eq.s32.totalorder %s4390_s14, 0  ;;  %p86_p4 = scmp.ne.s32.totalorder %s4374_s10, %s4370_s30 }
  0x11   : > { %s5085_s16 = smov (%p36_p0, %s35_s16), 0  ;;  %p4497_p5 = scmp.eq.s32.totalorder %s3072_s15, 0 }
  0x12   : > { %5057 = sst [smem:[#allocation20_spill]] %s5085_s16  ;;  %p4490_p3 = por %p55_p2, %p54_p1 }
  0x13   : > { %s43_s19 = ssub.s32 %s4386_s13, %s5085_s16  ;;  %p3073_p7 = scmp.ge.s32.totalorder %s4390_s14, 1 }
  0x14   : > { %s5058_s18 = scalar_select %p4490_p3, 1, 0 }
  0x15   : > { %s5059_s20 = scalar_select %p4497_p5, 1, 0 }
  0x16   : > { %p45_p6 = scmp.eq.s32.totalorder %s43_s19, 0  ;;  %p4504_p8 = por %p4497_p5, %p86_p4 }
  0x17   : > { %p275_p9 = scmp.lt.s32.totalorder %s4390_s14, 3  ;;  %s4392_s24 = smov [#allocation6]  }
  0x18   : > { %s5060_s21 = scalar_select %p4504_p8, 1, 0 }
  0x19   : > { %s4510_s22 = scalar_select %p45_p6, %s4378_s11, %s47_s17  }
  0x1a   : > { %p4512_p10 = pnand %p3073_p7, %p275_p9  ;;  %s288_s25 = sshll.u32 %s4392_s24, 4  ;;  %s289_s25 = int_to_ptr.vmem [resolvable:$true] %s288_s25 }
  0x1b   : > { %5061 = sst [smem:[#allocation21_spill]] %s4510_s22  ;;  %s4393_s26 = smov [#allocation9]  }
  0x1c   : > { %s5062_s23 = scalar_select %p4512_p10, 1, 0 }
  0x1d   : > { %p3650_p11 = pneg %p4512_p10  ;;  %s312_s27 = sshll.u32 %s4393_s26, 4  ;;  %s4524_s27 = int_to_ptr.vmem [resolvable:$true] %s312_s27 }
  0x1e   : > { %s4394_s29 = smov [#allocation12]   ;;  %s5064_s2 = sld [smem:[#allocation22_spill]] }
  0x1f   : > { %p4520_p12 = pnand %p3650_p11, %p4497_p5  ;;  %s4526_s30 = sshll.u32 %s4394_s29, 4  ;;  %s337_s30 = int_to_ptr.vmem [resolvable:$true] %s4526_s30 }
  0x21   : > { %p4536_p0 = pneg %p4520_p12 }
  0x24   : > { %s4132_s19 = scalar_lea.hbm %s5064_s2, 64 }
  0x25   : > { %p4133_p13 = scmp.ne.s32.totalorder %s5064_s2, %s4132_s19  ;;  %p4139_p4 = scmp.lt.u32.totalorder %s4132_s19, %s5064_s2 }
  0x27   : > { %p4135_p1 = pnand %p4536_p0, %p4133_p13 }
  0x29   : > { %p4136_p2 = pneg %p4135_p1 }
  0x2b   : > { %p4141_p6 = pnand %p4139_p4, %p4136_p2 }
  0x2d   : > { %4144 = shalt.err (!%p4141_p6)
}
  0x2e   : > { %s4145_s15 = scalar_lea.vmem %s289_s25, 64  ;;  %p4153_p5 = scmp.lt.s32.totalorder %s289_s25, %s289_s25 }
  0x2f   : > { %p4146_p7 = scmp.ne.s32.totalorder %s289_s25, %s4145_s15  ;;  %p4154_p8 = scmp.lt.s32.totalorder %s4145_s15, %s4145_s15 }
  0x31   : > { %p4148_p9 = pnand %p4146_p7, %p4536_p0  ;;  %p4155_p10 = por %p4154_p8, %p4153_p5 }
  0x33   : > { %p4149_p11 = pneg %p4148_p9 }
  0x35   : > { %p4156_p3 = pnand %p4155_p10, %p4149_p11 }
  0x37   : > { %4159 = shalt.err (!%p4156_p3)
}
  0x38   : > { %3653 = dma.hbm_to_vmem [thread:$0]  (!%p4520_p12), %s5064_s2, 64, %s289_s25, [#allocation7]  }
  0x39   : > { %s5066_s4 = sld [smem:[#allocation23_spill]] }
  0x3f   : > { %s4160_s24 = scalar_lea.hbm %s5066_s4, 16 }
  0x40   : > { %p4161_p13 = scmp.ne.s32.totalorder %s5066_s4, %s4160_s24  ;;  %p4167_p3 = scmp.lt.u32.totalorder %s4160_s24, %s5066_s4 }
  0x42   : > { %p4163_p1 = pnand %p4161_p13, %p4536_p0 }
  0x44   : > { %p4164_p5 = pneg %p4163_p1 }
  0x46   : > { %p4169_p8 = pnand %p4167_p3, %p4164_p5 }
  0x48   : > { %4172 = shalt.err (!%p4169_p8)
}
  0x49   : > { %s4173_s25 = scalar_lea.vmem %s4524_s27, 16  ;;  %s4180_s8 = scalar_lea.vmem %s4524_s27, 32 }
  0x4a   : > { %p4174_p10 = scmp.ne.s32.totalorder %s4524_s27, %s4173_s25  ;;  %p4181_p6 = scmp.lt.s32.totalorder %s4524_s27, %s4524_s27 }
  0x4b   : > { %p4182_p7 = scmp.lt.s32.totalorder %s4180_s8, %s4173_s25 }
  0x4c   : > { %p4176_p2 = pnand %p4174_p10, %p4536_p0 }
  0x4d   : > { %p4183_p9 = por %p4182_p7, %p4181_p6 }
  0x4e   : > { %p4177_p4 = pneg %p4176_p2 }
  0x50   : > { %p4184_p11 = pnand %p4183_p9, %p4177_p4 }
  0x52   : > { %4187 = shalt.err (!%p4184_p11)
}
  0x53   : > { %3659 = dma.hbm_to_vmem [thread:$0]  (!%p4520_p12), %s5066_s4, 16, %s4524_s27, [#allocation10]  }
  0x54   : > { %s4395_s17 = smov [#allocation8]   ;;  %s5067_s6 = sld [smem:[#allocation24_spill]] }
  0x55   : > { %s298_s22 = sshll.u32 %s4395_s17, 4  ;;  %s299_s22 = int_to_ptr.vmem [resolvable:$true] %s298_s22 }
  0x5a   : > { %s4188_s29 = scalar_lea.hbm %s5067_s6, 16 }
  0x5b   : > { %p4189_p13 = scmp.ne.s32.totalorder %s5067_s6, %s4188_s29  ;;  %p4195_p3 = scmp.lt.u32.totalorder %s4188_s29, %s5067_s6 }
  0x5d   : > { %p4191_p1 = pnand %p4189_p13, %p4536_p0 }
  0x5f   : > { %p4192_p5 = pneg %p4191_p1 }
  0x61   : > { %p4197_p8 = pnand %p4195_p3, %p4192_p5 }
  0x63   : > { %4200 = shalt.err (!%p4197_p8)
}
  0x64   : > { %s4201_s27 = scalar_lea.vmem %s337_s30, 16  ;;  %s4208_s9 = scalar_lea.vmem %s337_s30, 32 }
  0x65   : > { %p4202_p10 = scmp.ne.s32.totalorder %s337_s30, %s4201_s27  ;;  %p4209_p6 = scmp.lt.s32.totalorder %s337_s30, %s337_s30 }
  0x66   : > { %p4210_p7 = scmp.lt.s32.totalorder %s4208_s9, %s4201_s27 }
  0x67   : > { %p4204_p2 = pnand %p4202_p10, %p4536_p0 }
  0x68   : > { %p4211_p9 = por %p4210_p7, %p4209_p6 }
  0x69   : > { %p4205_p4 = pneg %p4204_p2 }
  0x6b   : > { %p4212_p11 = pnand %p4211_p9, %p4205_p4 }
  0x6d   : > { %4215 = shalt.err (!%p4212_p11)
}
  0x6e   : > { %3665 = dma.hbm_to_vmem [thread:$0]  (!%p4520_p12), %s5067_s6, 16, %s337_s30, [#allocation13]  }
  0x6f   : > { %s4216_s24 = scalar_lea.hbm %s5036_s3, 8192 }
  0x70   : > { %p4217_p13 = scmp.ne.s32.totalorder %s5036_s3, %s4216_s24  ;;  %p4223_p3 = scmp.lt.u32.totalorder %s4216_s24, %s5036_s3 }
  0x72   : > { %p4219_p1 = pnand %p4217_p13, %p4536_p0 }
  0x74   : > { %p4220_p5 = pneg %p4219_p1 }
  0x76   : > { %p4225_p8 = pnand %p4223_p3, %p4220_p5 }
  0x78   : > { %4228 = shalt.err (!%p4225_p8)
}
  0x79   : > { %s4229_s27 = scalar_lea.vmem %s299_s22, 8192  ;;  %p4237_p6 = scmp.lt.s32.totalorder %s299_s22, %s299_s22 }
  0x7a   : > { %p4230_p10 = scmp.ne.s32.totalorder %s299_s22, %s4229_s27  ;;  %p4238_p7 = scmp.lt.s32.totalorder %s4229_s27, %s4229_s27 }
  0x7c   : > { %p4232_p2 = pnand %p4230_p10, %p4536_p0  ;;  %p4239_p9 = por %p4238_p7, %p4237_p6 }
  0x7e   : > { %p4233_p4 = pneg %p4232_p2 }
  0x80   : > { %p4240_p11 = pnand %p4239_p9, %p4233_p4 }
  0x82   : > { %4243 = shalt.err (!%p4240_p11)
}
  0x83   : > { %s4396_s30 = smov 128   ;;  %s4397_s9 = smov 8  }
  0x84   : > { %3656 = dma.hbm_to_vmem [thread:$0]  (!%p4520_p12), %s5036_s3, 8192, %s299_s22, [#allocation7], %s4396_s30, %s4396_s30, %s4397_s9  }
  0x85   : > { %s4398_s2 = smov [#allocation11]   ;;  %s4399_s24 = smov [#allocation14]  }
  0x86   : > { %s322_s19 = sshll.u32 %s4398_s2, 4  ;;  %s347_s29 = sshll.u32 %s4399_s24, 4  ;;  %s323_s19 = int_to_ptr.vmem [resolvable:$true] %s322_s19  ;;  %s348_s29 = int_to_ptr.vmem [resolvable:$true] %s347_s29 }
  0x87   : > { %s4244_s8 = scalar_lea.hbm %s5038_s5, 2048 }
  0x88   : > { %p4245_p13 = scmp.ne.s32.totalorder %s5038_s5, %s4244_s8  ;;  %p4251_p3 = scmp.lt.u32.totalorder %s4244_s8, %s5038_s5 }
  0x8a   : > { %p4247_p1 = pnand %p4245_p13, %p4536_p0 }
  0x8c   : > { %p4248_p5 = pneg %p4247_p1 }
  0x8e   : > { %p4253_p8 = pnand %p4251_p3, %p4248_p5 }
  0x90   : > { %4256 = shalt.err (!%p4253_p8)
}
  0x91   : > { %s4257_s22 = scalar_lea.vmem %s323_s19, 2048  ;;  %p4265_p6 = scmp.lt.s32.totalorder %s323_s19, %s323_s19 }
  0x92   : > { %p4258_p10 = scmp.ne.s32.totalorder %s323_s19, %s4257_s22  ;;  %p4266_p7 = scmp.lt.s32.totalorder %s4257_s22, %s4257_s22 }
  0x94   : > { %p4260_p2 = pnand %p4258_p10, %p4536_p0  ;;  %p4267_p9 = por %p4266_p7, %p4265_p6 }
  0x96   : > { %p4261_p4 = pneg %p4260_p2 }
  0x98   : > { %p4268_p11 = pnand %p4267_p9, %p4261_p4 }
  0x9a   : > { %4271 = shalt.err (!%p4268_p11)
}
  0x9b   : > { %3662 = dma.hbm_to_vmem [thread:$0]  (!%p4520_p12), %s5038_s5, 2048, %s323_s19, [#allocation10], %s4396_s30, %s4396_s30, %s4397_s9  }
  0x9c   : > { %s4272_s17 = scalar_lea.hbm %s5040_s7, 16 }
  0x9d   : > { %p4273_p13 = scmp.ne.s32.totalorder %s5040_s7, %s4272_s17  ;;  %p4279_p3 = scmp.lt.u32.totalorder %s4272_s17, %s5040_s7 }
  0x9f   : > { %p4275_p1 = pnand %p4273_p13, %p4536_p0 }
  0xa1   : > { %p4276_p5 = pneg %p4275_p1 }
  0xa3   : > { %p4281_p8 = pnand %p4279_p3, %p4276_p5 }
  0xa5   : > { %4284 = shalt.err (!%p4281_p8)
}
  0xa6   : > { %s4285_s8 = scalar_lea.vmem %s348_s29, 16  ;;  %s4292_s30 = scalar_lea.vmem %s348_s29, 32 }
  0xa7   : > { %p4286_p10 = scmp.ne.s32.totalorder %s348_s29, %s4285_s8  ;;  %p4293_p6 = scmp.lt.s32.totalorder %s348_s29, %s348_s29 }
  0xa8   : > { %p4294_p7 = scmp.lt.s32.totalorder %s4292_s30, %s4285_s8 }
  0xa9   : > { %p4288_p2 = pnand %p4286_p10, %p4536_p0 }
  0xaa   : > { %p4295_p9 = por %p4294_p7, %p4293_p6 }
  0xab   : > { %p4289_p4 = pneg %p4288_p2 }
  0xad   : > { %p4296_p11 = pnand %p4295_p9, %p4289_p4 }
  0xaf   : > { %4299 = shalt.err (!%p4296_p11)
}
  0xb0   : > { %3668 = dma.hbm_to_vmem [thread:$0]  (!%p4520_p12), %s5040_s7, 16, %s348_s29, [#allocation13]  }
  0xb1   : > { %p3080_p13 = scmp.ge.s32.totalorder %s4390_s14, 2 }
  0xb2   : > { %p5068_p1 = scmp.ne.s32.totalorder (!%p3080_p13), %s5058_s18, 0 }
  0xb3   : > { %354 = sbr.rel (%p3080_p13) target bundleno = 221 (0xdd), region = 40 }
  0xba   : > { %357 = sbr.rel (!%p5068_p1) target bundleno = 194 (0xc2), region = 44  ;;  %s359_s26 = sand.u32 (%p5068_p1), 1, %s4378_s11  }
  0xbb   : > { %s3372_s27 = sshll.u32 (%p5068_p1), %s4386_s13, 5  ;;  %s3081_s22 = sshll.u32 (%p5068_p1), %s359_s26, 6 }
  0xbc   : > { %s367_s6 = scalar_lea.vmem (%p5068_p1), %s5033_s0, %s3372_s27  ;;  %s361_s28 = scalar_lea.vmem (%p5068_p1), [#allocation3], %s3081_s22 }
  0xbd   : > { %v380_v0 = vld [vmem:[%s367_s6] sm:$0xff] (%p5068_p1)  ;;  %v382_v1 = vld [vmem:[%s367_s6 + $0x8] sm:$0xff] (%p5068_p1)  ;;  %v384_v2 = vld [vmem:[%s367_s6 + $0x10] sm:$0xff] (%p5068_p1) }
  0xbe   : > { %381 = vst [vmem:[%s361_s28] sm:$0xff] (%p5068_p1), %v380_v0  ;;  %383 = vst [vmem:[%s361_s28 + $0x8] sm:$0xff] (%p5068_p1), %v382_v1  ;;  %v386_v3 = vld [vmem:[%s367_s6 + $0x18] sm:$0xff] (%p5068_p1)  ;;  %v388_v4 = vld [vmem:[%s367_s6 + $0x40] sm:$0xff] (%p5068_p1) }
  0xbf   : > { %385 = vst [vmem:[%s361_s28 + $0x10] sm:$0xff] (%p5068_p1), %v384_v2  ;;  %v390_v5 = vld [vmem:[%s367_s6 + $0x48] sm:$0xff] (%p5068_p1)  ;;  %387 = vst [vmem:[%s361_s28 + $0x18] sm:$0xff] (%p5068_p1), %v386_v3  ;;  %v392_v6 = vld [vmem:[%s367_s6 + $0x50] sm:$0xff] (%p5068_p1) }
  0xc0   : > { %389 = vst [vmem:[%s361_s28 + $0x20] sm:$0xff] (%p5068_p1), %v388_v4  ;;  %391 = vst [vmem:[%s361_s28 + $0x28] sm:$0xff] (%p5068_p1), %v390_v5  ;;  %v394_v7 = vld [vmem:[%s367_s6 + $0x58] sm:$0xff] (%p5068_p1) }
  0xc1   : > { %393 = vst [vmem:[%s361_s28 + $0x30] sm:$0xff] %v392_v6  ;;  %395 = vst [vmem:[%s361_s28 + $0x38] sm:$0xff] %v394_v7 }
  0xc2 PF: > { %s402_s29 = sand.u32 1, %s4378_s11   ;;  %s3374_s12 = sshll.u32 %s4386_s13, 15 }
  0xc3   : > { %s3084_s17 = sshll.u32 %s402_s29, 11  ;;  %s4662_s15 = scalar_lea.hbm %s5034_s1, %s3374_s12 }
  0xc4   : > { %s406_s25 = scalar_lea.vmem [#allocation4], %s3084_s17  ;;  %s4666_s30 = scalar_lea.sflag [#allocation5], %s402_s29 }
  0xc5   : > { %s414_s8 = sshll.u32 %s406_s25, 4  ;;  %s4300_s9 = scalar_lea.hbm %s4662_s15, 32768  ;;  %s4664_s8 = int_to_ptr.vmem [resolvable:$true] %s414_s8 }
  0xc6   : > { %p4301_p12 = scmp.ne.s32.totalorder %s4662_s15, %s4300_s9  ;;  %p5069_p0 = scmp.ne.s32.totalorder %s5058_s18, 0 }
  0xc7   : > { %s4304_s27 = scalar_lea.hbm %s5034_s1, 65536  ;;  %p4305_p8 = scmp.lt.u32.totalorder %s4662_s15, %s5034_s1 }
  0xc8   : > { %p4302_p5 = pnand %p4301_p12, %p5069_p0  ;;  %p4306_p10 = scmp.lt.u32.totalorder %s4304_s27, %s4300_s9 }
  0xc9   : > { %p4308_p4 = scmp.lt.u32.totalorder %s4300_s9, %s4662_s15 }
  0xca   : > { %p4303_p3 = pneg %p4302_p5  ;;  %p4307_p2 = por %p4306_p10, %p4305_p8 }
  0xcc   : > { %p4309_p6 = por %p4308_p4, %p4307_p2 }
  0xce   : > { %p4310_p7 = pnand %p4309_p6, %p4303_p3 }
  0xd0   : > { %4313 = shalt.err (!%p4310_p7)
}
  0xd1   : > { %s4314_s16 = scalar_lea.vmem %s4664_s8, 32768  ;;  %s4400_s6 = smov [#allocation4]  }
  0xd2   : > { %p4315_p9 = scmp.ne.s32.totalorder %s4664_s8, %s4314_s16  ;;  %s4318_s28 = sshll.u32 %s4400_s6, 4  ;;  %s4319_s28 = int_to_ptr.vmem [resolvable:$false] %s4318_s28 }
  0xd3   : > { %s4320_s29 = scalar_lea.vmem %s4319_s28, 65536  ;;  %p4321_p1 = scmp.lt.s32.totalorder %s4664_s8, %s4319_s28 }
  0xd4   : > { %p4316_p11 = pnand %p4315_p9, %p5069_p0  ;;  %p4322_p12 = scmp.lt.s32.totalorder %s4320_s29, %s4314_s16 }
  0xd6   : > { %p4317_p13 = pneg %p4316_p11  ;;  %p4323_p5 = por %p4322_p12, %p4321_p1 }
  0xd8   : > { %p4324_p8 = pnand %p4323_p5, %p4317_p13 }
  0xda   : > { %4327 = shalt.err (!%p4324_p8)
}
  0xdb   : > { %s4401_s12 = smov 256   ;;  %s4402_s17 = smov 16  }
  0xdc   : > { %3636 = dma.hbm_to_vmem [thread:$0]  (%p5069_p0), %s4662_s15, 32768, %s4664_s8, %s4666_s30, %s4401_s12, %s4401_s12, %s4402_s17  }
  0xdd PF: > { %p5070_p3 = scmp.ne.s32.totalorder %s5062_s23, 0 }
  0xde   : > { %s429_s2 = sand.u32 (!%p5070_p3), 1, %s4374_s10   ;;  %p5071_p10 = scmp.ne.s32.totalorder (!%p5070_p3), %s5060_s21, 0 }
  0xdf   : > { %426 = sbr.rel (%p5070_p3) target bundleno = 1282 (0x502), region = 71  ;;  %s3089_s24 = sshll.u32 (!%p5070_p3), %s429_s2, 6 }
  0xe0   : > { %s3090_s25 = sshll.u32 (!%p5070_p3), %s429_s2, 11  ;;  %s4693_s9 = scalar_lea.vmem (!%p5070_p3), [#allocation3], %s3089_s24 }
  0xe1   : > { %s436_s19 = scalar_lea.sflag (!%p5070_p3), [#allocation5], %s429_s2  ;;  %s4695_s26 = scalar_lea.vmem (!%p5070_p3), [#allocation4], %s3090_s25 }
  0xe6   : > { %4353 = dma.done.wait (%p5071_p10), %s436_s19, 32768  }
  0xe7   : > { %4355 = vsyncadd (%p5071_p10), %s436_s19, 4294934528  ;;  %p5072_p0 = scmp.ne.s32.totalorder %s5059_s20, 0 }
  0xe9   : > { %4357 = dma.done.wait (%p5072_p0), [#allocation7], 8256  }
  0xea   : > { %4359 = vsyncadd (%p5072_p0), [#allocation7], 4294959040 }
  0xeb   : > { %4361 = dma.done.wait (%p5072_p0), [#allocation10], 2064  }
  0xec   : > { %4363 = vsyncadd (%p5072_p0), [#allocation10], 4294965232 }
  0xed   : > { %4365 = dma.done.wait (%p5072_p0), [#allocation13], 32  }
  0xee   : > { %4367 = vsyncadd (%p5072_p0), [#allocation13], 4294967264  ;;  %s5073_s18 = sld [smem:[#allocation19_spill]] }
  0xf4   : > { %p3097_p2 = scmp.ne.s32.totalorder %s5073_s18, 0 }
  0xf5   : > { %v4403_v8 = vmov (!%p3097_p2), 0.0  }
  0xf6   : > { %525 = sbr.rel (%p3097_p2) target bundleno = 253 (0xfd), region = 107  ;;  %526 = vst [vmem:[#allocation2] sm:$0xff] (!%p3097_p2), %v4403_v8  ;;  %527 = vst [vmem:[#allocation2 + $0x8] sm:$0xff] (!%p3097_p2), %v4403_v8 }
  0xf7   : > { %528 = vst [vmem:[#allocation2 + $0x10] sm:$0xff] (!%p3097_p2), %v4403_v8  ;;  %529 = vst [vmem:[#allocation2 + $0x18] sm:$0xff] (!%p3097_p2), %v4403_v8 }
  0xf8   : > { %530 = vst [vmem:[#allocation2 + $0x20] sm:$0xff] (!%p3097_p2), %v4403_v8  ;;  %531 = vst [vmem:[#allocation2 + $0x28] sm:$0xff] (!%p3097_p2), %v4403_v8 }
  0xf9   : > { %532 = vst [vmem:[#allocation2 + $0x30] sm:$0xff] (!%p3097_p2), %v4403_v8  ;;  %533 = vst [vmem:[#allocation2 + $0x38] sm:$0xff] (!%p3097_p2), %v4403_v8 }
  0xfd PF: > { %v3740_v9 = vld [vmem:[%s4695_s26 + $0x4] ss:$16 sps:$4 sm:$0xff]   ;;  %v3742_v10 = vld [vmem:[%s4695_s26 + $0xc] ss:$16 sps:$4 sm:$0xff]   ;;  %v3744_v11 = vld [vmem:[%s4695_s26] ss:$16 sps:$4 sm:$0xff]  }
  0xfe   : > { %2126 = vmatprep.subr.bf16.mxu0 %v3740_v9  ;;  %v3745_v12 = vld [vmem:[%s4695_s26 + $0x8] ss:$16 sps:$4 sm:$0xff]   ;;  %2298 = vmatprep.subr.bf16.mxu1 %v3742_v10  ;;  %v3746_v13 = vld [vmem:[%s4695_s26 + $0x24] ss:$16 sps:$4 sm:$0xff]   ;;  %v3748_v14 = vld [vmem:[%s4695_s26 + $0x2c] ss:$16 sps:$4 sm:$0xff]  }
  0xff   : > { %2127 = vmatpush1.bf16.msra.mxu0 %v3744_v11  ;;  %2299 = vmatpush1.bf16.msra.mxu1 %v3745_v12  ;;  %v3750_v15 = vld [vmem:[%s4695_s26 + $0x20] ss:$16 sps:$4 sm:$0xff]   ;;  %v3751_v16 = vld [vmem:[%s4695_s26 + $0x28] ss:$16 sps:$4 sm:$0xff]   ;;  %v3752_v17 = vld [vmem:[%s4695_s26 + $0x44] ss:$16 sps:$4 sm:$0xff]  }
 0x100   : > { %2128 = vmatprep.subr.bf16.mxu0 %v3746_v13  ;;  %2300 = vmatprep.subr.bf16.mxu1 %v3748_v14  ;;  %v3754_v18 = vld [vmem:[%s4695_s26 + $0x4c] ss:$16 sps:$4 sm:$0xff]   ;;  %v3756_v19 = vld [vmem:[%s4695_s26 + $0x40] ss:$16 sps:$4 sm:$0xff]   ;;  %v3757_v20 = vld [vmem:[%s4695_s26 + $0x48] ss:$16 sps:$4 sm:$0xff]  }
 0x101   : > { %v3758_v21 = vld [vmem:[%s4695_s26 + $0x64] ss:$16 sps:$4 sm:$0xff]   ;;  %v3760_v22 = vld [vmem:[%s4695_s26 + $0x6c] ss:$16 sps:$4 sm:$0xff]   ;;  %v3762_v23 = vld [vmem:[%s4695_s26 + $0x60] ss:$16 sps:$4 sm:$0xff]  }
 0x102   : > { %v3763_v24 = vld [vmem:[%s4695_s26 + $0x68] ss:$16 sps:$4 sm:$0xff]   ;;  %v3764_v25 = vld [vmem:[%s4695_s26 + $0x84] ss:$16 sps:$4 sm:$0xff]   ;;  %v3766_v26 = vld [vmem:[%s4695_s26 + $0x8c] ss:$16 sps:$4 sm:$0xff]  }
 0x103   : > { %2129 = vmatpush1.bf16.msra.mxu0 %v3750_v15  ;;  %2301 = vmatpush1.bf16.msra.mxu1 %v3751_v16  ;;  %v3768_v27 = vld [vmem:[%s4695_s26 + $0x80] ss:$16 sps:$4 sm:$0xff]   ;;  %v3769_v28 = vld [vmem:[%s4695_s26 + $0x88] ss:$16 sps:$4 sm:$0xff]   ;;  %v3770_v29 = vld [vmem:[%s4695_s26 + $0xa4] ss:$16 sps:$4 sm:$0xff]  }
 0x104   : > { %2130 = vmatprep.subr.bf16.mxu0 %v3752_v17  ;;  %2302 = vmatprep.subr.bf16.mxu1 %v3754_v18  ;;  %v3772_v30 = vld [vmem:[%s4695_s26 + $0xac] ss:$16 sps:$4 sm:$0xff]   ;;  %v3774_v31 = vld [vmem:[%s4695_s26 + $0xa0] ss:$16 sps:$4 sm:$0xff]   ;;  %v3775_v32 = vld [vmem:[%s4695_s26 + $0xa8] ss:$16 sps:$4 sm:$0xff]  }
 0x105   : > { %v3776_v33 = vld [vmem:[%s4695_s26 + $0xc4] ss:$16 sps:$4 sm:$0xff]   ;;  %v3778_v34 = vld [vmem:[%s4695_s26 + $0xcc] ss:$16 sps:$4 sm:$0xff]   ;;  %v3780_v35 = vld [vmem:[%s4695_s26 + $0xc0] ss:$16 sps:$4 sm:$0xff]  }
 0x106   : > { %v3781_v36 = vld [vmem:[%s4695_s26 + $0xc8] ss:$16 sps:$4 sm:$0xff]   ;;  %v3782_v37 = vld [vmem:[%s4695_s26 + $0xe4] ss:$16 sps:$4 sm:$0xff]   ;;  %v3784_v38 = vld [vmem:[%s4695_s26 + $0xec] ss:$16 sps:$4 sm:$0xff]  }
 0x107   : > { %2131 = vmatpush1.bf16.msra.mxu0 %v3756_v19  ;;  %2303 = vmatpush1.bf16.msra.mxu1 %v3757_v20  ;;  %v3786_v39 = vld [vmem:[%s4695_s26 + $0xe0] ss:$16 sps:$4 sm:$0xff]   ;;  %v3787_v40 = vld [vmem:[%s4695_s26 + $0xe8] ss:$16 sps:$4 sm:$0xff]   ;;  %v3788_v41 = vld [vmem:[%s4695_s26 + $0x104] ss:$16 sps:$4 sm:$0xff]  }
 0x108   : > { %2132 = vmatprep.subr.bf16.mxu0 %v3758_v21  ;;  %2304 = vmatprep.subr.bf16.mxu1 %v3760_v22  ;;  %v3790_v42 = vld [vmem:[%s4695_s26 + $0x10c] ss:$16 sps:$4 sm:$0xff]   ;;  %v3792_v43 = vld [vmem:[%s4695_s26 + $0x100] ss:$16 sps:$4 sm:$0xff]   ;;  %v3793_v44 = vld [vmem:[%s4695_s26 + $0x108] ss:$16 sps:$4 sm:$0xff]  }
 0x109   : > { %v3794_v45 = vld [vmem:[%s4695_s26 + $0x124] ss:$16 sps:$4 sm:$0xff]   ;;  %v3796_v46 = vld [vmem:[%s4695_s26 + $0x12c] ss:$16 sps:$4 sm:$0xff]   ;;  %v3798_v47 = vld [vmem:[%s4695_s26 + $0x120] ss:$16 sps:$4 sm:$0xff]  }
 0x10a   : > { %v3799_v48 = vld [vmem:[%s4695_s26 + $0x128] ss:$16 sps:$4 sm:$0xff]   ;;  %v3800_v49 = vld [vmem:[%s4695_s26 + $0x144] ss:$16 sps:$4 sm:$0xff]   ;;  %v3802_v50 = vld [vmem:[%s4695_s26 + $0x14c] ss:$16 sps:$4 sm:$0xff]  }
 0x10b   : > { %2133 = vmatpush1.bf16.msra.mxu0 %v3762_v23  ;;  %2305 = vmatpush1.bf16.msra.mxu1 %v3763_v24  ;;  %v3804_v51 = vld [vmem:[%s4695_s26 + $0x140] ss:$16 sps:$4 sm:$0xff]   ;;  %v3805_v52 = vld [vmem:[%s4695_s26 + $0x148] ss:$16 sps:$4 sm:$0xff]   ;;  %v3806_v53 = vld [vmem:[%s4695_s26 + $0x164] ss:$16 sps:$4 sm:$0xff]  }
 0x10c   : > { %2134 = vmatprep.subr.bf16.mxu0 %v3764_v25  ;;  %2306 = vmatprep.subr.bf16.mxu1 %v3766_v26  ;;  %v3808_v54 = vld [vmem:[%s4695_s26 + $0x16c] ss:$16 sps:$4 sm:$0xff]   ;;  %v542_v55 = vld [vmem:[%s4693_s9] sm:$0xff]  ;;  %v3811_v58 = vld [vmem:[%s4695_s26 + $0x168] ss:$16 sps:$4 sm:$0xff]   ;;  %s5074_s20 = sld [smem:[#allocation19_spill]] }
 0x10d   : > { %v546_v56 = vld [vmem:[%s4693_s9 + $0x20] sm:$0xff]  ;;  %v3814_v61 = vld [vmem:[%s4695_s26 + $0x18c] ss:$16 sps:$4 sm:$0xff]   ;;  %v3817_v63 = vld [vmem:[%s4695_s26 + $0x188] ss:$16 sps:$4 sm:$0xff]  }
 0x10e   : > { %v3810_v57 = vld [vmem:[%s4695_s26 + $0x160] ss:$16 sps:$4 sm:$0xff]   ;;  %v3099_v59 = vcombine.high %v542_v55, %v546_v56  ;;  %v3812_v60 = vld [vmem:[%s4695_s26 + $0x184] ss:$16 sps:$4 sm:$0xff]   ;;  %v3820_v1 = vld [vmem:[%s4695_s26 + $0x1ac] ss:$16 sps:$4 sm:$0xff]   ;;  %v3098_v14 = vcombine.low %v542_v55, %v546_v56 }
 0x10f   : > { %2135 = vmatpush1.bf16.msra.mxu0 %v3768_v27  ;;  %2307 = vmatpush1.bf16.msra.mxu1 %v3769_v28  ;;  %v3816_v62 = vld [vmem:[%s4695_s26 + $0x180] ss:$16 sps:$4 sm:$0xff]   ;;  %v3818_v0 = vld [vmem:[%s4695_s26 + $0x1a4] ss:$16 sps:$4 sm:$0xff]   ;;  %v3823_v3 = vld [vmem:[%s4695_s26 + $0x1a8] ss:$16 sps:$4 sm:$0xff]  }
 0x110   : > { %2136 = vmatprep.subr.bf16.mxu0 %v3770_v29  ;;  %2308 = vmatprep.subr.bf16.mxu1 %v3772_v30  ;;  %v3822_v2 = vld [vmem:[%s4695_s26 + $0x1a0] ss:$16 sps:$4 sm:$0xff]   ;;  %v3824_v4 = vld [vmem:[%s4695_s26 + $0x1c4] ss:$16 sps:$4 sm:$0xff]   ;;  %v3826_v5 = vld [vmem:[%s4695_s26 + $0x1cc] ss:$16 sps:$4 sm:$0xff]  }
 0x111   : > { %2158 = vmatprep.mubr.bf16.mxu0 %v3099_v59  ;;  %2330 = vmatprep.mubr.bf16.mxu1 %v3099_v59  ;;  %v3828_v6 = vld [vmem:[%s4695_s26 + $0x1c0] ss:$16 sps:$4 sm:$0xff]   ;;  %v3829_v7 = vld [vmem:[%s4695_s26 + $0x1c8] ss:$16 sps:$4 sm:$0xff]   ;;  %v3830_v8 = vld [vmem:[%s4695_s26 + $0x1e4] ss:$16 sps:$4 sm:$0xff]  }
 0x112   : > { %v3832_v9 = vld [vmem:[%s4695_s26 + $0x1ec] ss:$16 sps:$4 sm:$0xff]   ;;  %v3834_v10 = vld [vmem:[%s4695_s26 + $0x1e0] ss:$16 sps:$4 sm:$0xff]   ;;  %v3835_v11 = vld [vmem:[%s4695_s26 + $0x1e8] ss:$16 sps:$4 sm:$0xff]  }
 0x113   : > { %2137 = vmatpush1.bf16.msra.mxu0 %v3774_v31  ;;  %2309 = vmatpush1.bf16.msra.mxu1 %v3775_v32  ;;  %v3838_v12 = vld [vmem:[%s4695_s26 + $0x204] ss:$16 sps:$4 sm:$0xff]   ;;  %v3841_v13 = vld [vmem:[%s4695_s26 + $0x20c] ss:$16 sps:$4 sm:$0xff]   ;;  %v3836_v15 = vld [vmem:[%s4695_s26 + $0x200] ss:$16 sps:$4 sm:$0xff]  }
 0x114   : > { %2138 = vmatprep.subr.bf16.mxu0 %v3776_v33  ;;  %2310 = vmatprep.subr.bf16.mxu1 %v3778_v34  ;;  %v3839_v16 = vld [vmem:[%s4695_s26 + $0x208] ss:$16 sps:$4 sm:$0xff]   ;;  %v3844_v17 = vld [vmem:[%s4695_s26 + $0x224] ss:$16 sps:$4 sm:$0xff]   ;;  %v3847_v18 = vld [vmem:[%s4695_s26 + $0x22c] ss:$16 sps:$4 sm:$0xff]  }
 0x115   : > { %v3842_v19 = vld [vmem:[%s4695_s26 + $0x220] ss:$16 sps:$4 sm:$0xff]   ;;  %v3845_v20 = vld [vmem:[%s4695_s26 + $0x228] ss:$16 sps:$4 sm:$0xff]   ;;  %v3850_v21 = vld [vmem:[%s4695_s26 + $0x244] ss:$16 sps:$4 sm:$0xff]  }
 0x116   : > { %v3853_v22 = vld [vmem:[%s4695_s26 + $0x24c] ss:$16 sps:$4 sm:$0xff]   ;;  %v3848_v23 = vld [vmem:[%s4695_s26 + $0x240] ss:$16 sps:$4 sm:$0xff]   ;;  %v3851_v24 = vld [vmem:[%s4695_s26 + $0x248] ss:$16 sps:$4 sm:$0xff]  }
 0x117   : > { %2139 = vmatpush1.bf16.msra.mxu0 %v3780_v35  ;;  %2311 = vmatpush1.bf16.msra.mxu1 %v3781_v36  ;;  %v3856_v25 = vld [vmem:[%s4695_s26 + $0x264] ss:$16 sps:$4 sm:$0xff]   ;;  %v3859_v26 = vld [vmem:[%s4695_s26 + $0x26c] ss:$16 sps:$4 sm:$0xff]   ;;  %v3854_v27 = vld [vmem:[%s4695_s26 + $0x260] ss:$16 sps:$4 sm:$0xff]  }
 0x118   : > { %2140 = vmatprep.subr.bf16.mxu0 %v3782_v37  ;;  %2312 = vmatprep.subr.bf16.mxu1 %v3784_v38  ;;  %v3857_v28 = vld [vmem:[%s4695_s26 + $0x268] ss:$16 sps:$4 sm:$0xff]   ;;  %v3862_v29 = vld [vmem:[%s4695_s26 + $0x284] ss:$16 sps:$4 sm:$0xff]   ;;  %v3865_v30 = vld [vmem:[%s4695_s26 + $0x28c] ss:$16 sps:$4 sm:$0xff]  }
 0x119   : > { %v3860_v31 = vld [vmem:[%s4695_s26 + $0x280] ss:$16 sps:$4 sm:$0xff]   ;;  %v3863_v32 = vld [vmem:[%s4695_s26 + $0x288] ss:$16 sps:$4 sm:$0xff]   ;;  %v3868_v33 = vld [vmem:[%s4695_s26 + $0x2a4] ss:$16 sps:$4 sm:$0xff]  }
 0x11a   : > { %v3871_v34 = vld [vmem:[%s4695_s26 + $0x2ac] ss:$16 sps:$4 sm:$0xff]   ;;  %v3866_v35 = vld [vmem:[%s4695_s26 + $0x2a0] ss:$16 sps:$4 sm:$0xff]   ;;  %v3869_v36 = vld [vmem:[%s4695_s26 + $0x2a8] ss:$16 sps:$4 sm:$0xff]  }
 0x11b   : > { %2141 = vmatpush1.bf16.msra.mxu0 %v3786_v39  ;;  %2313 = vmatpush1.bf16.msra.mxu1 %v3787_v40  ;;  %v3874_v37 = vld [vmem:[%s4695_s26 + $0x2c4] ss:$16 sps:$4 sm:$0xff]   ;;  %v3877_v38 = vld [vmem:[%s4695_s26 + $0x2cc] ss:$16 sps:$4 sm:$0xff]   ;;  %v3893_v55 = vld [vmem:[%s4695_s26 + $0x328] ss:$16 sps:$4 sm:$0xff]  }
 0x11c   : > { %2142 = vmatprep.subr.bf16.mxu0 %v3788_v41  ;;  %2314 = vmatprep.subr.bf16.mxu1 %v3790_v42  ;;  %v4807_v39 = vld [vmem:[%s4693_s9 + $0x8] sm:$0xff]  ;;  %v3872_v41 = vld [vmem:[%s4695_s26 + $0x2c0] ss:$16 sps:$4 sm:$0xff]   ;;  %v3898_v56 = vld [vmem:[%s4695_s26 + $0x344] ss:$16 sps:$4 sm:$0xff]   ;;  %p3362_p4 = scmp.ne.s32.totalorder %s5074_s20, 1 }
 0x11d   : > { %v4810_v40 = vld [vmem:[%s4693_s9 + $0x28] sm:$0xff]  ;;  %s5075_s15 = sld [smem:[#allocation26_spill]] (!%p3362_p4)  ;;  %s5076_s4 = sld [smem:[#allocation25_spill]] (!%p3362_p4) }
 0x11e   : > { %v3875_v42 = vld [vmem:[%s4695_s26 + $0x2c8] ss:$16 sps:$4 sm:$0xff]  }
 0x11f   : > { %2143 = vmatpush1.bf16.msra.mxu0 %v3792_v43  ;;  %2315 = vmatpush1.bf16.msra.mxu1 %v3793_v44  ;;  %v3101_v43 = vcombine.high %v4807_v39, %v4810_v40  ;;  %v3880_v44 = vld [vmem:[%s4695_s26 + $0x2e4] ss:$16 sps:$4 sm:$0xff]   ;;  %v3899_v59 = vld [vmem:[%s4695_s26 + $0x348] ss:$16 sps:$4 sm:$0xff]  }
 0x120   : > { %2144 = vmatprep.subr.bf16.mxu0 %v3794_v45  ;;  %2316 = vmatprep.subr.bf16.mxu1 %v3796_v46  ;;  %v3883_v45 = vld [vmem:[%s4695_s26 + $0x2ec] ss:$16 sps:$4 sm:$0xff]   ;;  %v3878_v46 = vld [vmem:[%s4695_s26 + $0x2e0] ss:$16 sps:$4 sm:$0xff]  }
 0x123   : > { %2145 = vmatpush1.bf16.msra.mxu0 %v3798_v47  ;;  %2317 = vmatpush1.bf16.msra.mxu1 %v3799_v48  ;;  %v3881_v47 = vld [vmem:[%s4695_s26 + $0x2e8] ss:$16 sps:$4 sm:$0xff]   ;;  %v3886_v48 = vld [vmem:[%s4695_s26 + $0x304] ss:$16 sps:$4 sm:$0xff]  }
 0x124   : > { %2146 = vmatprep.subr.bf16.mxu0 %v3800_v49  ;;  %2318 = vmatprep.subr.bf16.mxu1 %v3802_v50  ;;  %v3889_v49 = vld [vmem:[%s4695_s26 + $0x30c] ss:$16 sps:$4 sm:$0xff]   ;;  %v3884_v50 = vld [vmem:[%s4695_s26 + $0x300] ss:$16 sps:$4 sm:$0xff]  }
 0x127   : > { %2147 = vmatpush1.bf16.msra.mxu0 %v3804_v51  ;;  %2319 = vmatpush1.bf16.msra.mxu1 %v3805_v52  ;;  %v3887_v51 = vld [vmem:[%s4695_s26 + $0x308] ss:$16 sps:$4 sm:$0xff]   ;;  %v3892_v52 = vld [vmem:[%s4695_s26 + $0x324] ss:$16 sps:$4 sm:$0xff]  }
 0x128   : > { %2148 = vmatprep.subr.bf16.mxu0 %v3806_v53  ;;  %2320 = vmatprep.subr.bf16.mxu1 %v3808_v54  ;;  %v3895_v53 = vld [vmem:[%s4695_s26 + $0x32c] ss:$16 sps:$4 sm:$0xff]   ;;  %v3890_v54 = vld [vmem:[%s4695_s26 + $0x320] ss:$16 sps:$4 sm:$0xff]  }
 0x12b   : > { %2149 = vmatpush1.bf16.msra.mxu0 %v3810_v57  ;;  %2321 = vmatpush1.bf16.msra.mxu1 %v3811_v58  ;;  %v3901_v57 = vld [vmem:[%s4695_s26 + $0x34c] ss:$16 sps:$4 sm:$0xff]   ;;  %v3896_v58 = vld [vmem:[%s4695_s26 + $0x340] ss:$16 sps:$4 sm:$0xff]  }
 0x12c   : > { %2150 = vmatprep.subr.bf16.mxu0 %v3812_v60  ;;  %2322 = vmatprep.subr.bf16.mxu1 %v3814_v61  ;;  %v3904_v60 = vld [vmem:[%s4695_s26 + $0x364] ss:$16 sps:$4 sm:$0xff]   ;;  %v3907_v61 = vld [vmem:[%s4695_s26 + $0x36c] ss:$16 sps:$4 sm:$0xff]  }
 0x12f   : > { %2151 = vmatpush1.bf16.msra.mxu0 %v3816_v62  ;;  %2323 = vmatpush1.bf16.msra.mxu1 %v3817_v63  ;;  %v3902_v62 = vld [vmem:[%s4695_s26 + $0x360] ss:$16 sps:$4 sm:$0xff]   ;;  %v3905_v63 = vld [vmem:[%s4695_s26 + $0x368] ss:$16 sps:$4 sm:$0xff]  }
 0x130   : > { %2152 = vmatprep.subr.bf16.mxu0 %v3818_v0  ;;  %2324 = vmatprep.subr.bf16.mxu1 %v3820_v1  ;;  %v3910_v0 = vld [vmem:[%s4695_s26 + $0x384] ss:$16 sps:$4 sm:$0xff]   ;;  %v3913_v1 = vld [vmem:[%s4695_s26 + $0x38c] ss:$16 sps:$4 sm:$0xff]  }
 0x133   : > { %2153 = vmatpush1.bf16.msra.mxu0 %v3822_v2  ;;  %2325 = vmatpush1.bf16.msra.mxu1 %v3823_v3  ;;  %v3908_v2 = vld [vmem:[%s4695_s26 + $0x380] ss:$16 sps:$4 sm:$0xff]   ;;  %v3911_v3 = vld [vmem:[%s4695_s26 + $0x388] ss:$16 sps:$4 sm:$0xff]  }
 0x134   : > { %2154 = vmatprep.subr.bf16.mxu0 %v3824_v4  ;;  %2326 = vmatprep.subr.bf16.mxu1 %v3826_v5  ;;  %v3916_v4 = vld [vmem:[%s4695_s26 + $0x3a4] ss:$16 sps:$4 sm:$0xff]   ;;  %v3919_v5 = vld [vmem:[%s4695_s26 + $0x3ac] ss:$16 sps:$4 sm:$0xff]  }
 0x137   : > { %2155 = vmatpush1.bf16.msra.mxu0 %v3828_v6  ;;  %2327 = vmatpush1.bf16.msra.mxu1 %v3829_v7  ;;  %v3914_v6 = vld [vmem:[%s4695_s26 + $0x3a0] ss:$16 sps:$4 sm:$0xff]   ;;  %v3917_v7 = vld [vmem:[%s4695_s26 + $0x3a8] ss:$16 sps:$4 sm:$0xff]  }
 0x138   : > { %2156 = vmatprep.subr.bf16.mxu0 %v3830_v8  ;;  %2328 = vmatprep.subr.bf16.mxu1 %v3832_v9  ;;  %v3922_v8 = vld [vmem:[%s4695_s26 + $0x3c4] ss:$16 sps:$4 sm:$0xff]   ;;  %v3925_v9 = vld [vmem:[%s4695_s26 + $0x3cc] ss:$16 sps:$4 sm:$0xff]  }
 0x13b   : > { %2157 = vmatpush1.bf16.msra.mxu0 %v3834_v10  ;;  %2329 = vmatpush1.bf16.msra.mxu1 %v3835_v11  ;;  %v3920_v10 = vld [vmem:[%s4695_s26 + $0x3c0] ss:$16 sps:$4 sm:$0xff]   ;;  %v3923_v11 = vld [vmem:[%s4695_s26 + $0x3c8] ss:$16 sps:$4 sm:$0xff]  }
 0x13c   : > { %2169 = vmatprep.subr.bf16.mxu0 %v3838_v12  ;;  %2341 = vmatprep.subr.bf16.mxu1 %v3841_v13  ;;  %v3928_v12 = vld [vmem:[%s4695_s26 + $0x3e4] ss:$16 sps:$4 sm:$0xff]   ;;  %v3931_v13 = vld [vmem:[%s4695_s26 + $0x3ec] ss:$16 sps:$4 sm:$0xff]  }
 0x13e   : > { %2159 = vmatmul.mubr.bf16.vlgmr.msra.gmra.mrb[0].mxu0 %v3098_v14  ;;  %2331 = vmatmul.mubr.bf16.vlgmr.msra.gmra.mrb[0].mxu1 %v3098_v14  ;;  %v3926_v14 = vld [vmem:[%s4695_s26 + $0x3e0] ss:$16 sps:$4 sm:$0xff]  }
 0x13f   : > { %2170 = vmatpush1.bf16.msra.mxu0 %v3836_v15  ;;  %2342 = vmatpush1.bf16.msra.mxu1 %v3839_v16  ;;  %v3929_v15 = vld [vmem:[%s4695_s26 + $0x3e8] ss:$16 sps:$4 sm:$0xff]   ;;  %v3934_v16 = vld [vmem:[%s4695_s26 + $0x404] ss:$16 sps:$4 sm:$0xff]  }
 0x140   : > { %2171 = vmatprep.subr.bf16.mxu0 %v3844_v17  ;;  %2343 = vmatprep.subr.bf16.mxu1 %v3847_v18  ;;  %v3937_v17 = vld [vmem:[%s4695_s26 + $0x40c] ss:$16 sps:$4 sm:$0xff]   ;;  %v3100_v18 = vcombine.low %v4807_v39, %v4810_v40  ;;  %v3959_v39 = vld [vmem:[%s4695_s26 + $0x488] ss:$16 sps:$4 sm:$0xff]   ;;  %v3964_v40 = vld [vmem:[%s4695_s26 + $0x4a4] ss:$16 sps:$4 sm:$0xff]  }
 0x141   : > { %2201 = vmatprep.mubr.bf16.mxu0 %v3101_v43  ;;  %2373 = vmatprep.mubr.bf16.mxu1 %v3101_v43  ;;  %v3965_v43 = vld [vmem:[%s4695_s26 + $0x4a8] ss:$16 sps:$4 sm:$0xff]  }
 0x143   : > { %2172 = vmatpush1.bf16.msra.mxu0 %v3842_v19  ;;  %2344 = vmatpush1.bf16.msra.mxu1 %v3845_v20  ;;  %v3932_v19 = vld [vmem:[%s4695_s26 + $0x400] ss:$16 sps:$4 sm:$0xff]   ;;  %v3935_v20 = vld [vmem:[%s4695_s26 + $0x408] ss:$16 sps:$4 sm:$0xff]  }
 0x144   : > { %2173 = vmatprep.subr.bf16.mxu0 %v3850_v21  ;;  %2345 = vmatprep.subr.bf16.mxu1 %v3853_v22  ;;  %v3940_v21 = vld [vmem:[%s4695_s26 + $0x424] ss:$16 sps:$4 sm:$0xff]   ;;  %v3943_v22 = vld [vmem:[%s4695_s26 + $0x42c] ss:$16 sps:$4 sm:$0xff]  }
 0x147   : > { %2174 = vmatpush1.bf16.msra.mxu0 %v3848_v23  ;;  %2346 = vmatpush1.bf16.msra.mxu1 %v3851_v24  ;;  %v4861_v23 = vld [vmem:[%s4693_s9 + $0x10] sm:$0xff] }
 0x148   : > { %2175 = vmatprep.subr.bf16.mxu0 %v3856_v25  ;;  %2347 = vmatprep.subr.bf16.mxu1 %v3859_v26  ;;  %v4864_v24 = vld [vmem:[%s4693_s9 + $0x30] sm:$0xff] }
 0x149   : > { %v3103_v25 = vcombine.high %v4861_v23, %v4864_v24  ;;  %v3938_v26 = vld [vmem:[%s4695_s26 + $0x420] ss:$16 sps:$4 sm:$0xff]  }
 0x14b   : > { %2176 = vmatpush1.bf16.msra.mxu0 %v3854_v27  ;;  %2348 = vmatpush1.bf16.msra.mxu1 %v3857_v28  ;;  %v3941_v27 = vld [vmem:[%s4695_s26 + $0x428] ss:$16 sps:$4 sm:$0xff]   ;;  %v3946_v28 = vld [vmem:[%s4695_s26 + $0x444] ss:$16 sps:$4 sm:$0xff]  }
 0x14c   : > { %2177 = vmatprep.subr.bf16.mxu0 %v3862_v29  ;;  %2349 = vmatprep.subr.bf16.mxu1 %v3865_v30  ;;  %v3949_v29 = vld [vmem:[%s4695_s26 + $0x44c] ss:$16 sps:$4 sm:$0xff]   ;;  %v3944_v30 = vld [vmem:[%s4695_s26 + $0x440] ss:$16 sps:$4 sm:$0xff]  }
 0x14f   : > { %2178 = vmatpush1.bf16.msra.mxu0 %v3860_v31  ;;  %2350 = vmatpush1.bf16.msra.mxu1 %v3863_v32  ;;  %v3947_v31 = vld [vmem:[%s4695_s26 + $0x448] ss:$16 sps:$4 sm:$0xff]   ;;  %v3952_v32 = vld [vmem:[%s4695_s26 + $0x464] ss:$16 sps:$4 sm:$0xff]  }
 0x150   : > { %2179 = vmatprep.subr.bf16.mxu0 %v3868_v33  ;;  %2351 = vmatprep.subr.bf16.mxu1 %v3871_v34  ;;  %v3955_v33 = vld [vmem:[%s4695_s26 + $0x46c] ss:$16 sps:$4 sm:$0xff]   ;;  %v3950_v34 = vld [vmem:[%s4695_s26 + $0x460] ss:$16 sps:$4 sm:$0xff]  }
 0x153   : > { %2180 = vmatpush1.bf16.msra.mxu0 %v3866_v35  ;;  %2352 = vmatpush1.bf16.msra.mxu1 %v3869_v36  ;;  %v3953_v35 = vld [vmem:[%s4695_s26 + $0x468] ss:$16 sps:$4 sm:$0xff]   ;;  %v3958_v36 = vld [vmem:[%s4695_s26 + $0x484] ss:$16 sps:$4 sm:$0xff]  }
 0x154   : > { %2181 = vmatprep.subr.bf16.mxu0 %v3874_v37  ;;  %2353 = vmatprep.subr.bf16.mxu1 %v3877_v38  ;;  %v3961_v37 = vld [vmem:[%s4695_s26 + $0x48c] ss:$16 sps:$4 sm:$0xff]   ;;  %v3956_v38 = vld [vmem:[%s4695_s26 + $0x480] ss:$16 sps:$4 sm:$0xff]  }
 0x157   : > { %2182 = vmatpush1.bf16.msra.mxu0 %v3872_v41  ;;  %2354 = vmatpush1.bf16.msra.mxu1 %v3875_v42  ;;  %v3967_v41 = vld [vmem:[%s4695_s26 + $0x4ac] ss:$16 sps:$4 sm:$0xff]   ;;  %v3962_v42 = vld [vmem:[%s4695_s26 + $0x4a0] ss:$16 sps:$4 sm:$0xff]  }
 0x158   : > { %2183 = vmatprep.subr.bf16.mxu0 %v3880_v44  ;;  %2355 = vmatprep.subr.bf16.mxu1 %v3883_v45  ;;  %v3970_v44 = vld [vmem:[%s4695_s26 + $0x4c4] ss:$16 sps:$4 sm:$0xff]   ;;  %v3973_v45 = vld [vmem:[%s4695_s26 + $0x4cc] ss:$16 sps:$4 sm:$0xff]  }
 0x15b   : > { %2184 = vmatpush1.bf16.msra.mxu0 %v3878_v46  ;;  %2356 = vmatpush1.bf16.msra.mxu1 %v3881_v47  ;;  %v3968_v46 = vld [vmem:[%s4695_s26 + $0x4c0] ss:$16 sps:$4 sm:$0xff]   ;;  %v3971_v47 = vld [vmem:[%s4695_s26 + $0x4c8] ss:$16 sps:$4 sm:$0xff]  }
 0x15c   : > { %2185 = vmatprep.subr.bf16.mxu0 %v3886_v48  ;;  %2357 = vmatprep.subr.bf16.mxu1 %v3889_v49  ;;  %v3976_v48 = vld [vmem:[%s4695_s26 + $0x4e4] ss:$16 sps:$4 sm:$0xff]   ;;  %v3979_v49 = vld [vmem:[%s4695_s26 + $0x4ec] ss:$16 sps:$4 sm:$0xff]  }
 0x15f   : > { %2186 = vmatpush1.bf16.msra.mxu0 %v3884_v50  ;;  %2358 = vmatpush1.bf16.msra.mxu1 %v3887_v51  ;;  %v3974_v50 = vld [vmem:[%s4695_s26 + $0x4e0] ss:$16 sps:$4 sm:$0xff]   ;;  %v3977_v51 = vld [vmem:[%s4695_s26 + $0x4e8] ss:$16 sps:$4 sm:$0xff]  }
 0x160   : > { %2187 = vmatprep.subr.bf16.mxu0 %v3892_v52  ;;  %2359 = vmatprep.subr.bf16.mxu1 %v3895_v53  ;;  %v3982_v52 = vld [vmem:[%s4695_s26 + $0x504] ss:$16 sps:$4 sm:$0xff]   ;;  %v3985_v53 = vld [vmem:[%s4695_s26 + $0x50c] ss:$16 sps:$4 sm:$0xff]  }
 0x163   : > { %2188 = vmatpush1.bf16.msra.mxu0 %v3890_v54  ;;  %2360 = vmatpush1.bf16.msra.mxu1 %v3893_v55  ;;  %v3980_v54 = vld [vmem:[%s4695_s26 + $0x500] ss:$16 sps:$4 sm:$0xff]   ;;  %v3983_v55 = vld [vmem:[%s4695_s26 + $0x508] ss:$16 sps:$4 sm:$0xff]  }
 0x164   : > { %2189 = vmatprep.subr.bf16.mxu0 %v3898_v56  ;;  %2361 = vmatprep.subr.bf16.mxu1 %v3901_v57  ;;  %v3988_v56 = vld [vmem:[%s4695_s26 + $0x524] ss:$16 sps:$4 sm:$0xff]   ;;  %v3991_v57 = vld [vmem:[%s4695_s26 + $0x52c] ss:$16 sps:$4 sm:$0xff]  }
 0x167   : > { %2190 = vmatpush1.bf16.msra.mxu0 %v3896_v58  ;;  %2362 = vmatpush1.bf16.msra.mxu1 %v3899_v59  ;;  %v3986_v58 = vld [vmem:[%s4695_s26 + $0x520] ss:$16 sps:$4 sm:$0xff]   ;;  %v3989_v59 = vld [vmem:[%s4695_s26 + $0x528] ss:$16 sps:$4 sm:$0xff]  }
 0x168   : > { %2191 = vmatprep.subr.bf16.mxu0 %v3904_v60  ;;  %2363 = vmatprep.subr.bf16.mxu1 %v3907_v61  ;;  %v3994_v60 = vld [vmem:[%s4695_s26 + $0x544] ss:$16 sps:$4 sm:$0xff]   ;;  %v3997_v61 = vld [vmem:[%s4695_s26 + $0x54c] ss:$16 sps:$4 sm:$0xff]  }
 0x16b   : > { %2192 = vmatpush1.bf16.msra.mxu0 %v3902_v62  ;;  %2364 = vmatpush1.bf16.msra.mxu1 %v3905_v63  ;;  %v3992_v62 = vld [vmem:[%s4695_s26 + $0x540] ss:$16 sps:$4 sm:$0xff]   ;;  %v3995_v63 = vld [vmem:[%s4695_s26 + $0x548] ss:$16 sps:$4 sm:$0xff]  }
 0x16c   : > { %2193 = vmatprep.subr.bf16.mxu0 %v3910_v0  ;;  %2365 = vmatprep.subr.bf16.mxu1 %v3913_v1  ;;  %v4000_v0 = vld [vmem:[%s4695_s26 + $0x564] ss:$16 sps:$4 sm:$0xff]   ;;  %v4003_v1 = vld [vmem:[%s4695_s26 + $0x56c] ss:$16 sps:$4 sm:$0xff]  }
 0x16f   : > { %2194 = vmatpush1.bf16.msra.mxu0 %v3908_v2  ;;  %2366 = vmatpush1.bf16.msra.mxu1 %v3911_v3  ;;  %v3998_v2 = vld [vmem:[%s4695_s26 + $0x560] ss:$16 sps:$4 sm:$0xff]   ;;  %v4001_v3 = vld [vmem:[%s4695_s26 + $0x568] ss:$16 sps:$4 sm:$0xff]  }
 0x170   : > { %2195 = vmatprep.subr.bf16.mxu0 %v3916_v4  ;;  %2367 = vmatprep.subr.bf16.mxu1 %v3919_v5  ;;  %v4006_v4 = vld [vmem:[%s4695_s26 + $0x584] ss:$16 sps:$4 sm:$0xff]   ;;  %v4009_v5 = vld [vmem:[%s4695_s26 + $0x58c] ss:$16 sps:$4 sm:$0xff]  }
 0x173   : > { %2196 = vmatpush1.bf16.msra.mxu0 %v3914_v6  ;;  %2368 = vmatpush1.bf16.msra.mxu1 %v3917_v7  ;;  %v4004_v6 = vld [vmem:[%s4695_s26 + $0x580] ss:$16 sps:$4 sm:$0xff]   ;;  %v4007_v7 = vld [vmem:[%s4695_s26 + $0x588] ss:$16 sps:$4 sm:$0xff]  }
 0x174   : > { %2197 = vmatprep.subr.bf16.mxu0 %v3922_v8  ;;  %2369 = vmatprep.subr.bf16.mxu1 %v3925_v9  ;;  %v4012_v8 = vld [vmem:[%s4695_s26 + $0x5a4] ss:$16 sps:$4 sm:$0xff]   ;;  %v4015_v9 = vld [vmem:[%s4695_s26 + $0x5ac] ss:$16 sps:$4 sm:$0xff]  }
 0x177   : > { %2198 = vmatpush1.bf16.msra.mxu0 %v3920_v10  ;;  %2370 = vmatpush1.bf16.msra.mxu1 %v3923_v11  ;;  %v4010_v10 = vld [vmem:[%s4695_s26 + $0x5a0] ss:$16 sps:$4 sm:$0xff]   ;;  %v4013_v11 = vld [vmem:[%s4695_s26 + $0x5a8] ss:$16 sps:$4 sm:$0xff]  }
 0x178   : > { %2199 = vmatprep.subr.bf16.mxu0 %v3928_v12  ;;  %2371 = vmatprep.subr.bf16.mxu1 %v3931_v13  ;;  %v4018_v12 = vld [vmem:[%s4695_s26 + $0x5c4] ss:$16 sps:$4 sm:$0xff]   ;;  %v4021_v13 = vld [vmem:[%s4695_s26 + $0x5cc] ss:$16 sps:$4 sm:$0xff]  }
 0x17b   : > { %2200 = vmatpush1.bf16.msra.mxu0 %v3926_v14  ;;  %2372 = vmatpush1.bf16.msra.mxu1 %v3929_v15  ;;  %v4016_v14 = vld [vmem:[%s4695_s26 + $0x5c0] ss:$16 sps:$4 sm:$0xff]   ;;  %v4019_v15 = vld [vmem:[%s4695_s26 + $0x5c8] ss:$16 sps:$4 sm:$0xff]  }
 0x17c   : > { %2212 = vmatprep.subr.bf16.mxu0 %v3934_v16  ;;  %2384 = vmatprep.subr.bf16.mxu1 %v3937_v17  ;;  %v4024_v16 = vld [vmem:[%s4695_s26 + $0x5e4] ss:$16 sps:$4 sm:$0xff]   ;;  %v4027_v17 = vld [vmem:[%s4695_s26 + $0x5ec] ss:$16 sps:$4 sm:$0xff]  }
 0x17e   : > { %2202 = vmatmul.mubr.bf16.vlgmr.msra.gmra.mrb[0].mxu0 %v3100_v18  ;;  %2374 = vmatmul.mubr.bf16.vlgmr.msra.gmra.mrb[0].mxu1 %v3100_v18  ;;  %v4022_v18 = vld [vmem:[%s4695_s26 + $0x5e0] ss:$16 sps:$4 sm:$0xff]  }
 0x17f   : > { %2213 = vmatpush1.bf16.msra.mxu0 %v3932_v19  ;;  %2385 = vmatpush1.bf16.msra.mxu1 %v3935_v20  ;;  %v4025_v19 = vld [vmem:[%s4695_s26 + $0x5e8] ss:$16 sps:$4 sm:$0xff]   ;;  %v4030_v20 = vld [vmem:[%s4695_s26 + $0x604] ss:$16 sps:$4 sm:$0xff]  }
 0x180   : > { %2214 = vmatprep.subr.bf16.mxu0 %v3940_v21  ;;  %2386 = vmatprep.subr.bf16.mxu1 %v3943_v22  ;;  %v4033_v21 = vld [vmem:[%s4695_s26 + $0x60c] ss:$16 sps:$4 sm:$0xff]   ;;  %v3102_v22 = vcombine.low %v4861_v23, %v4864_v24  ;;  %v4034_v24 = vld [vmem:[%s4695_s26 + $0x620] ss:$16 sps:$4 sm:$0xff]  }
 0x181   : > { %2244 = vmatprep.mubr.bf16.mxu0 %v3103_v25  ;;  %2416 = vmatprep.mubr.bf16.mxu1 %v3103_v25  ;;  %v4931_v25 = vld [vmem:[%s4693_s9 + $0x18] sm:$0xff] }
 0x183   : > { %2215 = vmatpush1.bf16.msra.mxu0 %v3938_v26  ;;  %2387 = vmatpush1.bf16.msra.mxu1 %v3941_v27  ;;  %v4934_v26 = vld [vmem:[%s4693_s9 + $0x38] sm:$0xff]  ;;  %v4028_v27 = vld [vmem:[%s4695_s26 + $0x600] ss:$16 sps:$4 sm:$0xff]  }
 0x184   : > { %2216 = vmatprep.subr.bf16.mxu0 %v3946_v28  ;;  %2388 = vmatprep.subr.bf16.mxu1 %v3949_v29  ;;  %v4031_v28 = vld [vmem:[%s4695_s26 + $0x608] ss:$16 sps:$4 sm:$0xff]   ;;  %v4036_v29 = vld [vmem:[%s4695_s26 + $0x624] ss:$16 sps:$4 sm:$0xff]   ;;  %v3105_v23 = vcombine.high %v4931_v25, %v4934_v26 }
 0x187   : > { %2217 = vmatpush1.bf16.msra.mxu0 %v3944_v30  ;;  %2389 = vmatpush1.bf16.msra.mxu1 %v3947_v31  ;;  %v4039_v30 = vld [vmem:[%s4695_s26 + $0x62c] ss:$16 sps:$4 sm:$0xff]   ;;  %v4037_v31 = vld [vmem:[%s4695_s26 + $0x628] ss:$16 sps:$4 sm:$0xff]  }
 0x188   : > { %2218 = vmatprep.subr.bf16.mxu0 %v3952_v32  ;;  %2390 = vmatprep.subr.bf16.mxu1 %v3955_v33  ;;  %v4042_v32 = vld [vmem:[%s4695_s26 + $0x644] ss:$16 sps:$4 sm:$0xff]   ;;  %v4045_v33 = vld [vmem:[%s4695_s26 + $0x64c] ss:$16 sps:$4 sm:$0xff]  }
 0x18b   : > { %2219 = vmatpush1.bf16.msra.mxu0 %v3950_v34  ;;  %2391 = vmatpush1.bf16.msra.mxu1 %v3953_v35  ;;  %v4040_v34 = vld [vmem:[%s4695_s26 + $0x640] ss:$16 sps:$4 sm:$0xff]   ;;  %v4043_v35 = vld [vmem:[%s4695_s26 + $0x648] ss:$16 sps:$4 sm:$0xff]  }
 0x18c   : > { %2220 = vmatprep.subr.bf16.mxu0 %v3958_v36  ;;  %2392 = vmatprep.subr.bf16.mxu1 %v3961_v37  ;;  %v4048_v36 = vld [vmem:[%s4695_s26 + $0x664] ss:$16 sps:$4 sm:$0xff]   ;;  %v4051_v37 = vld [vmem:[%s4695_s26 + $0x66c] ss:$16 sps:$4 sm:$0xff]  }
 0x18f   : > { %2221 = vmatpush1.bf16.msra.mxu0 %v3956_v38  ;;  %2393 = vmatpush1.bf16.msra.mxu1 %v3959_v39  ;;  %v4046_v38 = vld [vmem:[%s4695_s26 + $0x660] ss:$16 sps:$4 sm:$0xff]   ;;  %v4049_v39 = vld [vmem:[%s4695_s26 + $0x668] ss:$16 sps:$4 sm:$0xff]  }
 0x190   : > { %2222 = vmatprep.subr.bf16.mxu0 %v3964_v40  ;;  %2394 = vmatprep.subr.bf16.mxu1 %v3967_v41  ;;  %v4054_v40 = vld [vmem:[%s4695_s26 + $0x684] ss:$16 sps:$4 sm:$0xff]   ;;  %v4057_v41 = vld [vmem:[%s4695_s26 + $0x68c] ss:$16 sps:$4 sm:$0xff]  }
 0x193   : > { %2223 = vmatpush1.bf16.msra.mxu0 %v3962_v42  ;;  %2395 = vmatpush1.bf16.msra.mxu1 %v3965_v43  ;;  %v4052_v42 = vld [vmem:[%s4695_s26 + $0x680] ss:$16 sps:$4 sm:$0xff]   ;;  %v4055_v43 = vld [vmem:[%s4695_s26 + $0x688] ss:$16 sps:$4 sm:$0xff]  }
 0x194   : > { %2224 = vmatprep.subr.bf16.mxu0 %v3970_v44  ;;  %2396 = vmatprep.subr.bf16.mxu1 %v3973_v45  ;;  %v4060_v44 = vld [vmem:[%s4695_s26 + $0x6a4] ss:$16 sps:$4 sm:$0xff]   ;;  %v4063_v45 = vld [vmem:[%s4695_s26 + $0x6ac] ss:$16 sps:$4 sm:$0xff]  }
 0x197   : > { %2225 = vmatpush1.bf16.msra.mxu0 %v3968_v46  ;;  %2397 = vmatpush1.bf16.msra.mxu1 %v3971_v47  ;;  %v4058_v46 = vld [vmem:[%s4695_s26 + $0x6a0] ss:$16 sps:$4 sm:$0xff]   ;;  %v4061_v47 = vld [vmem:[%s4695_s26 + $0x6a8] ss:$16 sps:$4 sm:$0xff]  }
 0x198   : > { %2226 = vmatprep.subr.bf16.mxu0 %v3976_v48  ;;  %2398 = vmatprep.subr.bf16.mxu1 %v3979_v49  ;;  %v4066_v48 = vld [vmem:[%s4695_s26 + $0x6c4] ss:$16 sps:$4 sm:$0xff]   ;;  %v4069_v49 = vld [vmem:[%s4695_s26 + $0x6cc] ss:$16 sps:$4 sm:$0xff]  }
 0x19b   : > { %2227 = vmatpush1.bf16.msra.mxu0 %v3974_v50  ;;  %2399 = vmatpush1.bf16.msra.mxu1 %v3977_v51  ;;  %v4064_v50 = vld [vmem:[%s4695_s26 + $0x6c0] ss:$16 sps:$4 sm:$0xff]   ;;  %v4067_v51 = vld [vmem:[%s4695_s26 + $0x6c8] ss:$16 sps:$4 sm:$0xff]  }
 0x19c   : > { %2228 = vmatprep.subr.bf16.mxu0 %v3982_v52  ;;  %2400 = vmatprep.subr.bf16.mxu1 %v3985_v53  ;;  %v4072_v52 = vld [vmem:[%s4695_s26 + $0x6e4] ss:$16 sps:$4 sm:$0xff]   ;;  %v4075_v53 = vld [vmem:[%s4695_s26 + $0x6ec] ss:$16 sps:$4 sm:$0xff]  }
 0x19f   : > { %2229 = vmatpush1.bf16.msra.mxu0 %v3980_v54  ;;  %2401 = vmatpush1.bf16.msra.mxu1 %v3983_v55  ;;  %v4070_v54 = vld [vmem:[%s4695_s26 + $0x6e0] ss:$16 sps:$4 sm:$0xff]   ;;  %v4073_v55 = vld [vmem:[%s4695_s26 + $0x6e8] ss:$16 sps:$4 sm:$0xff]  }
 0x1a0   : > { %2230 = vmatprep.subr.bf16.mxu0 %v3988_v56  ;;  %2402 = vmatprep.subr.bf16.mxu1 %v3991_v57  ;;  %v4078_v56 = vld [vmem:[%s4695_s26 + $0x704] ss:$16 sps:$4 sm:$0xff]   ;;  %v4081_v57 = vld [vmem:[%s4695_s26 + $0x70c] ss:$16 sps:$4 sm:$0xff]  }
 0x1a3   : > { %2231 = vmatpush1.bf16.msra.mxu0 %v3986_v58  ;;  %2403 = vmatpush1.bf16.msra.mxu1 %v3989_v59  ;;  %v4076_v58 = vld [vmem:[%s4695_s26 + $0x700] ss:$16 sps:$4 sm:$0xff]   ;;  %v4079_v59 = vld [vmem:[%s4695_s26 + $0x708] ss:$16 sps:$4 sm:$0xff]  }
 0x1a4   : > { %2232 = vmatprep.subr.bf16.mxu0 %v3994_v60  ;;  %2404 = vmatprep.subr.bf16.mxu1 %v3997_v61  ;;  %v4084_v60 = vld [vmem:[%s4695_s26 + $0x724] ss:$16 sps:$4 sm:$0xff]   ;;  %v4087_v61 = vld [vmem:[%s4695_s26 + $0x72c] ss:$16 sps:$4 sm:$0xff]  }
 0x1a7   : > { %2233 = vmatpush1.bf16.msra.mxu0 %v3992_v62  ;;  %2405 = vmatpush1.bf16.msra.mxu1 %v3995_v63  ;;  %v4082_v62 = vld [vmem:[%s4695_s26 + $0x720] ss:$16 sps:$4 sm:$0xff]   ;;  %v4085_v63 = vld [vmem:[%s4695_s26 + $0x728] ss:$16 sps:$4 sm:$0xff]  }
 0x1a8   : > { %2234 = vmatprep.subr.bf16.mxu0 %v4000_v0  ;;  %2406 = vmatprep.subr.bf16.mxu1 %v4003_v1  ;;  %v4090_v0 = vld [vmem:[%s4695_s26 + $0x744] ss:$16 sps:$4 sm:$0xff]   ;;  %v4093_v1 = vld [vmem:[%s4695_s26 + $0x74c] ss:$16 sps:$4 sm:$0xff]  }
 0x1ab   : > { %2235 = vmatpush1.bf16.msra.mxu0 %v3998_v2  ;;  %2407 = vmatpush1.bf16.msra.mxu1 %v4001_v3  ;;  %v4088_v2 = vld [vmem:[%s4695_s26 + $0x740] ss:$16 sps:$4 sm:$0xff]   ;;  %v4091_v3 = vld [vmem:[%s4695_s26 + $0x748] ss:$16 sps:$4 sm:$0xff]  }
 0x1ac   : > { %2236 = vmatprep.subr.bf16.mxu0 %v4006_v4  ;;  %2408 = vmatprep.subr.bf16.mxu1 %v4009_v5  ;;  %v4096_v4 = vld [vmem:[%s4695_s26 + $0x764] ss:$16 sps:$4 sm:$0xff]   ;;  %v4099_v5 = vld [vmem:[%s4695_s26 + $0x76c] ss:$16 sps:$4 sm:$0xff]  }
 0x1af   : > { %2237 = vmatpush1.bf16.msra.mxu0 %v4004_v6  ;;  %2409 = vmatpush1.bf16.msra.mxu1 %v4007_v7  ;;  %v4094_v6 = vld [vmem:[%s4695_s26 + $0x760] ss:$16 sps:$4 sm:$0xff]   ;;  %v4097_v7 = vld [vmem:[%s4695_s26 + $0x768] ss:$16 sps:$4 sm:$0xff]  }
 0x1b0   : > { %2238 = vmatprep.subr.bf16.mxu0 %v4012_v8  ;;  %2410 = vmatprep.subr.bf16.mxu1 %v4015_v9  ;;  %v4102_v8 = vld [vmem:[%s4695_s26 + $0x784] ss:$16 sps:$4 sm:$0xff]   ;;  %v4105_v9 = vld [vmem:[%s4695_s26 + $0x78c] ss:$16 sps:$4 sm:$0xff]  }
 0x1b3   : > { %2239 = vmatpush1.bf16.msra.mxu0 %v4010_v10  ;;  %2411 = vmatpush1.bf16.msra.mxu1 %v4013_v11  ;;  %v4100_v10 = vld [vmem:[%s4695_s26 + $0x780] ss:$16 sps:$4 sm:$0xff]   ;;  %v4103_v11 = vld [vmem:[%s4695_s26 + $0x788] ss:$16 sps:$4 sm:$0xff]  }
 0x1b4   : > { %2240 = vmatprep.subr.bf16.mxu0 %v4018_v12  ;;  %2412 = vmatprep.subr.bf16.mxu1 %v4021_v13  ;;  %v4108_v12 = vld [vmem:[%s4695_s26 + $0x7a4] ss:$16 sps:$4 sm:$0xff]   ;;  %v4111_v13 = vld [vmem:[%s4695_s26 + $0x7ac] ss:$16 sps:$4 sm:$0xff]  }
 0x1b7   : > { %2241 = vmatpush1.bf16.msra.mxu0 %v4016_v14  ;;  %2413 = vmatpush1.bf16.msra.mxu1 %v4019_v15  ;;  %v4106_v14 = vld [vmem:[%s4695_s26 + $0x7a0] ss:$16 sps:$4 sm:$0xff]   ;;  %v4109_v15 = vld [vmem:[%s4695_s26 + $0x7a8] ss:$16 sps:$4 sm:$0xff]  }
 0x1b8   : > { %2242 = vmatprep.subr.bf16.mxu0 %v4024_v16  ;;  %2414 = vmatprep.subr.bf16.mxu1 %v4027_v17  ;;  %v4114_v16 = vld [vmem:[%s4695_s26 + $0x7c4] ss:$16 sps:$4 sm:$0xff]   ;;  %v4117_v17 = vld [vmem:[%s4695_s26 + $0x7cc] ss:$16 sps:$4 sm:$0xff]  }
 0x1bb   : > { %2243 = vmatpush1.bf16.msra.mxu0 %v4022_v18  ;;  %2415 = vmatpush1.bf16.msra.mxu1 %v4025_v19  ;;  %v4112_v18 = vld [vmem:[%s4695_s26 + $0x7c0] ss:$16 sps:$4 sm:$0xff]   ;;  %v4115_v19 = vld [vmem:[%s4695_s26 + $0x7c8] ss:$16 sps:$4 sm:$0xff]  }
 0x1bc   : > { %2255 = vmatprep.subr.bf16.mxu0 %v4030_v20  ;;  %2427 = vmatprep.subr.bf16.mxu1 %v4033_v21  ;;  %v4120_v20 = vld [vmem:[%s4695_s26 + $0x7e4] ss:$16 sps:$4 sm:$0xff]   ;;  %v4123_v21 = vld [vmem:[%s4695_s26 + $0x7ec] ss:$16 sps:$4 sm:$0xff]  }
 0x1be   : > { %2245 = vmatmul.mubr.bf16.vlgmr.msra.gmra.mrb[0].mxu0 %v3102_v22  ;;  %2417 = vmatmul.mubr.bf16.vlgmr.msra.gmra.mrb[0].mxu1 %v3102_v22  ;;  %v4118_v22 = vld [vmem:[%s4695_s26 + $0x7e0] ss:$16 sps:$4 sm:$0xff]  }
 0x1bf   : > { %2256 = vmatpush1.bf16.msra.mxu0 %v4028_v27  ;;  %2428 = vmatpush1.bf16.msra.mxu1 %v4031_v28  ;;  %v4121_v27 = vld [vmem:[%s4695_s26 + $0x7e8] ss:$16 sps:$4 sm:$0xff]   ;;  %v3104_v28 = vcombine.low %v4931_v25, %v4934_v26 }
 0x1c0   : > { %2257 = vmatprep.subr.bf16.mxu0 %v4036_v29  ;;  %2429 = vmatprep.subr.bf16.mxu1 %v4039_v30  ;;  %v534_v29 = vld [vmem:[#allocation2] sm:$0xff]  ;;  %v536_v30 = vld [vmem:[#allocation2 + $0x10] sm:$0xff] }
 0x1c1   : > { %2287 = vmatprep.mubr.bf16.mxu0 %v3105_v23  ;;  %2459 = vmatprep.mubr.bf16.mxu1 %v3105_v23  ;;  %v535_v23 = vld [vmem:[#allocation2 + $0x8] sm:$0xff] }
 0x1c3   : > { %2258 = vmatpush1.bf16.msra.mxu0 %v4034_v24  ;;  %2430 = vmatpush1.bf16.msra.mxu1 %v4037_v31  ;;  %v537_v24 = vld [vmem:[#allocation2 + $0x18] sm:$0xff] }
 0x1c4   : > { %2259 = vmatprep.subr.bf16.mxu0 %v4042_v32  ;;  %2431 = vmatprep.subr.bf16.mxu1 %v4045_v33  ;;  %v538_v33 = vld [vmem:[#allocation2 + $0x20] sm:$0xff] }
 0x1c7   : > { %2260 = vmatpush1.bf16.msra.mxu0 %v4040_v34  ;;  %2432 = vmatpush1.bf16.msra.mxu1 %v4043_v35  ;;  %v540_v34 = vld [vmem:[#allocation2 + $0x30] sm:$0xff] }
 0x1c8   : > { %2261 = vmatprep.subr.bf16.mxu0 %v4048_v36  ;;  %2433 = vmatprep.subr.bf16.mxu1 %v4051_v37 }
 0x1cb   : > { %2262 = vmatpush1.bf16.msra.mxu0 %v4046_v38  ;;  %2434 = vmatpush1.bf16.msra.mxu1 %v4049_v39  ;;  %v539_v39 = vld [vmem:[#allocation2 + $0x28] sm:$0xff] }
 0x1cc   : > { %2263 = vmatprep.subr.bf16.mxu0 %v4054_v40  ;;  %2435 = vmatprep.subr.bf16.mxu1 %v4057_v41  ;;  %v541_v40 = vld [vmem:[#allocation2 + $0x38] sm:$0xff] }
 0x1cf   : > { %2264 = vmatpush1.bf16.msra.mxu0 %v4052_v42  ;;  %2436 = vmatpush1.bf16.msra.mxu1 %v4055_v43 }
 0x1d0   : > { %2265 = vmatprep.subr.bf16.mxu0 %v4060_v44  ;;  %2437 = vmatprep.subr.bf16.mxu1 %v4063_v45 }
 0x1d3   : > { %2266 = vmatpush1.bf16.msra.mxu0 %v4058_v46  ;;  %2438 = vmatpush1.bf16.msra.mxu1 %v4061_v47 }
 0x1d4   : > { %2267 = vmatprep.subr.bf16.mxu0 %v4066_v48  ;;  %2439 = vmatprep.subr.bf16.mxu1 %v4069_v49  ;;  %v2552_v49 = vld [vmem:[#allocation8 + $0x80] sm:$0xff] (!%p3362_p4) }
 0x1d7   : > { %2268 = vmatpush1.bf16.msra.mxu0 %v4064_v50  ;;  %2440 = vmatpush1.bf16.msra.mxu1 %v4067_v51  ;;  %v2553_v50 = vld [vmem:[#allocation8 + $0x88] sm:$0xff] (!%p3362_p4)  ;;  %v2536_v51 = vld [vmem:[#allocation8] sm:$0xff] (!%p3362_p4) }
 0x1d8   : > { %2269 = vmatprep.subr.bf16.mxu0 %v4072_v52  ;;  %2441 = vmatprep.subr.bf16.mxu1 %v4075_v53  ;;  %v3504_v52 = vpack.c.bf16 (!%p3362_p4), %v2553_v50, %v2552_v49  ;;  %v2537_v53 = vld [vmem:[#allocation8 + $0x8] sm:$0xff] (!%p3362_p4) }
 0x1db   : > { %2270 = vmatpush1.bf16.msra.mxu0 %v4070_v54  ;;  %2442 = vmatpush1.bf16.msra.mxu1 %v4073_v55  ;;  %v2584_v54 = vld [vmem:[#allocation8 + $0x180] sm:$0xff] (!%p3362_p4)  ;;  %v2585_v55 = vld [vmem:[#allocation8 + $0x188] sm:$0xff] (!%p3362_p4) }
 0x1dc   : > { %2271 = vmatprep.subr.bf16.mxu0 %v4078_v56  ;;  %2443 = vmatprep.subr.bf16.mxu1 %v4081_v57  ;;  %v3506_v56 = vpack.c.bf16 (!%p3362_p4), %v2537_v53, %v2536_v51  ;;  %v3536_v57 = vpack.c.bf16 (!%p3362_p4), %v2585_v55, %v2584_v54  ;;  %v2547_v53 = vld [vmem:[#allocation8 + $0x58] sm:$0xff] (!%p3362_p4)  ;;  %v2578_v54 = vld [vmem:[#allocation8 + $0x150] sm:$0xff] (!%p3362_p4) }
 0x1df   : > { %2272 = vmatpush1.bf16.msra.mxu0 %v4076_v58  ;;  %2444 = vmatpush1.bf16.msra.mxu1 %v4079_v59  ;;  %v2568_v58 = vld [vmem:[#allocation8 + $0x100] sm:$0xff] (!%p3362_p4)  ;;  %v2569_v59 = vld [vmem:[#allocation8 + $0x108] sm:$0xff] (!%p3362_p4) }
 0x1e0   : > { %2273 = vmatprep.subr.bf16.mxu0 %v4084_v60  ;;  %2445 = vmatprep.subr.bf16.mxu1 %v4087_v61  ;;  %v2554_v60 = vld [vmem:[#allocation8 + $0x90] sm:$0xff] (!%p3362_p4)  ;;  %v3538_v61 = vpack.c.bf16 (!%p3362_p4), %v2569_v59, %v2568_v58  ;;  %v2565_v58 = vld [vmem:[#allocation8 + $0xe8] sm:$0xff] (!%p3362_p4) }
 0x1e3   : > { %2274 = vmatpush1.bf16.msra.mxu0 %v4082_v62  ;;  %2446 = vmatpush1.bf16.msra.mxu1 %v4085_v63  ;;  %v2555_v62 = vld [vmem:[#allocation8 + $0x98] sm:$0xff] (!%p3362_p4)  ;;  %v2538_v63 = vld [vmem:[#allocation8 + $0x10] sm:$0xff] (!%p3362_p4) }
 0x1e4   : > { %2275 = vmatprep.subr.bf16.mxu0 %v4090_v0  ;;  %2447 = vmatprep.subr.bf16.mxu1 %v4093_v1  ;;  %v2539_v0 = vld [vmem:[#allocation8 + $0x18] sm:$0xff] (!%p3362_p4)  ;;  %v3508_v1 = vpack.c.bf16 (!%p3362_p4), %v2555_v62, %v2554_v60  ;;  %v2597_v62 = vld [vmem:[#allocation8 + $0x1e8] sm:$0xff] (!%p3362_p4) }
 0x1e7   : > { %2276 = vmatpush1.bf16.msra.mxu0 %v4088_v2  ;;  %2448 = vmatpush1.bf16.msra.mxu1 %v4091_v3  ;;  %v3510_v2 = vpack.c.bf16 (!%p3362_p4), %v2539_v0, %v2538_v63  ;;  %v2586_v3 = vld [vmem:[#allocation8 + $0x190] sm:$0xff] (!%p3362_p4) }
 0x1e8   : > { %2277 = vmatprep.subr.bf16.mxu0 %v4096_v4  ;;  %2449 = vmatprep.subr.bf16.mxu1 %v4099_v5  ;;  %v2587_v4 = vld [vmem:[#allocation8 + $0x198] sm:$0xff] (!%p3362_p4)  ;;  %v2570_v5 = vld [vmem:[#allocation8 + $0x110] sm:$0xff] (!%p3362_p4) }
 0x1eb   : > { %2278 = vmatpush1.bf16.msra.mxu0 %v4094_v6  ;;  %2450 = vmatpush1.bf16.msra.mxu1 %v4097_v7  ;;  %v3540_v6 = vpack.c.bf16 (!%p3362_p4), %v2587_v4, %v2586_v3  ;;  %v2571_v7 = vld [vmem:[#allocation8 + $0x118] sm:$0xff] (!%p3362_p4)  ;;  %v2580_v3 = vld [vmem:[#allocation8 + $0x160] sm:$0xff] (!%p3362_p4) }
 0x1ec   : > { %2279 = vmatprep.subr.bf16.mxu0 %v4102_v8  ;;  %2451 = vmatprep.subr.bf16.mxu1 %v4105_v9  ;;  %v2556_v8 = vld [vmem:[#allocation8 + $0xa0] sm:$0xff] (!%p3362_p4)  ;;  %v2557_v9 = vld [vmem:[#allocation8 + $0xa8] sm:$0xff] (!%p3362_p4) }
 0x1ef   : > { %2280 = vmatpush1.bf16.msra.mxu0 %v4100_v10  ;;  %2452 = vmatpush1.bf16.msra.mxu1 %v4103_v11  ;;  %v3542_v10 = vpack.c.bf16 (!%p3362_p4), %v2571_v7, %v2570_v5  ;;  %v3512_v11 = vpack.c.bf16 (!%p3362_p4), %v2557_v9, %v2556_v8  ;;  %v2581_v7 = vld [vmem:[#allocation8 + $0x168] sm:$0xff] (!%p3362_p4)  ;;  %v2498_v9 = vld [vmem:[#allocation6] sm:$0xf] (!%p3362_p4) }
 0x1f0   : > { %2281 = vmatprep.subr.bf16.mxu0 %v4108_v12  ;;  %2453 = vmatprep.subr.bf16.mxu1 %v4111_v13  ;;  %v2540_v12 = vld [vmem:[#allocation8 + $0x20] sm:$0xff] (!%p3362_p4)  ;;  %v2541_v13 = vld [vmem:[#allocation8 + $0x28] sm:$0xff] (!%p3362_p4) }
 0x1f3   : > { %2282 = vmatpush1.bf16.msra.mxu0 %v4106_v14  ;;  %2454 = vmatpush1.bf16.msra.mxu1 %v4109_v15  ;;  %v2588_v14 = vld [vmem:[#allocation8 + $0x1a0] sm:$0xff] (!%p3362_p4)  ;;  %v2589_v15 = vld [vmem:[#allocation8 + $0x1a8] sm:$0xff] (!%p3362_p4) }
 0x1f4   : > { %2283 = vmatprep.subr.bf16.mxu0 %v4114_v16  ;;  %2455 = vmatprep.subr.bf16.mxu1 %v4117_v17  ;;  %v2572_v16 = vld [vmem:[#allocation8 + $0x120] sm:$0xff] (!%p3362_p4)  ;;  %v2573_v17 = vld [vmem:[#allocation8 + $0x128] sm:$0xff] (!%p3362_p4) }
 0x1f7   : > { %2284 = vmatpush1.bf16.msra.mxu0 %v4112_v18  ;;  %2456 = vmatpush1.bf16.msra.mxu1 %v4115_v19  ;;  %v3514_v18 = vpack.c.bf16 (!%p3362_p4), %v2541_v13, %v2540_v12  ;;  %v3544_v19 = vpack.c.bf16 (!%p3362_p4), %v2589_v15, %v2588_v14  ;;  %v2567_v12 = vld [vmem:[#allocation8 + $0xf8] sm:$0xff] (!%p3362_p4) }
 0x1f8   : > { %2285 = vmatprep.subr.bf16.mxu0 %v4120_v20  ;;  %2457 = vmatprep.subr.bf16.mxu1 %v4123_v21  ;;  %v2558_v20 = vld [vmem:[#allocation8 + $0xb0] sm:$0xff] (!%p3362_p4)  ;;  %v2559_v21 = vld [vmem:[#allocation8 + $0xb8] sm:$0xff] (!%p3362_p4) }
 0x1fb   : > { %2286 = vmatpush1.bf16.msra.mxu0 %v4118_v22  ;;  %2458 = vmatpush1.bf16.msra.mxu1 %v4121_v27  ;;  %v2542_v22 = vld [vmem:[#allocation8 + $0x30] sm:$0xff] (!%p3362_p4)  ;;  %v3546_v27 = vpack.c.bf16 (!%p3362_p4), %v2573_v17, %v2572_v16 }
 0x1fc   : > { %3505 = vmatprep.subr.bf16.mxu0 (!%p3362_p4), %v3504_v52  ;;  %3537 = vmatprep.subr.bf16.mxu1 (!%p3362_p4), %v3536_v57  ;;  %v2546_v52 = vld [vmem:[#allocation8 + $0x50] sm:$0xff] (!%p3362_p4)  ;;  %v2564_v57 = vld [vmem:[#allocation8 + $0xe0] sm:$0xff] (!%p3362_p4) }
 0x1fd   : > { %v3526_v0 = vpack.c.bf16 (!%p3362_p4), %v2547_v53, %v2546_v52  ;;  %v2550_v16 = vld [vmem:[#allocation8 + $0x70] sm:$0xff] (!%p3362_p4) }
 0x1fe   : > { %2288 = vmatmul.mubr.bf16.vlgmr.msra.gmra.mrb[0].mxu0 %v3104_v28  ;;  %2460 = vmatmul.mubr.bf16.vlgmr.msra.gmra.mrb[0].mxu1 %v3104_v28  ;;  %v3516_v28 = vpack.c.bf16 (!%p3362_p4), %v2559_v21, %v2558_v20  ;;  %v2598_v17 = vld [vmem:[#allocation8 + $0x1f0] sm:$0xff] (!%p3362_p4)  ;;  %v2551_v21 = vld [vmem:[#allocation8 + $0x78] sm:$0xff] (!%p3362_p4) }
 0x1ff   : > { %3507 = vmatpush3.bf16.msra.mxu0 (!%p3362_p4), %v3506_v56  ;;  %3539 = vmatpush3.bf16.msra.mxu1 (!%p3362_p4), %v3538_v61  ;;  %v2579_v56 = vld [vmem:[#allocation8 + $0x158] sm:$0xff] (!%p3362_p4)  ;;  %v2596_v61 = vld [vmem:[#allocation8 + $0x1e0] sm:$0xff] (!%p3362_p4) }
 0x200   : > { %3509 = vmatprep.subr.bf16.mxu0 (!%p3362_p4), %v3508_v1  ;;  %3541 = vmatprep.subr.bf16.mxu1 (!%p3362_p4), %v3540_v6  ;;  %v2548_v1 = vld [vmem:[#allocation8 + $0x60] sm:$0xff] (!%p3362_p4)  ;;  %v3558_v5 = vpack.c.bf16 (!%p3362_p4), %v2579_v56, %v2578_v54  ;;  %v3528_v6 = vpack.c.bf16 (!%p3362_p4), %v2565_v58, %v2564_v57  ;;  %v2762_v58 = vld [vmem:[#allocation11 + $0x28] sm:$0xff] (!%p3362_p4) }
 0x201   : > { %v2761_v57 = vld [vmem:[#allocation11 + $0x20] sm:$0xff] (!%p3362_p4) }
 0x203   : > { %3511 = vmatpush3.bf16.msra.mxu0 (!%p3362_p4), %v3510_v2  ;;  %3543 = vmatpush3.bf16.msra.mxu1 (!%p3362_p4), %v3542_v10  ;;  %v2549_v2 = vld [vmem:[#allocation8 + $0x68] sm:$0xff] (!%p3362_p4)  ;;  %v3560_v10 = vpack.c.bf16 (!%p3362_p4), %v2597_v62, %v2596_v61  ;;  %v2763_v61 = vld [vmem:[#allocation11 + $0x30] sm:$0xff] (!%p3362_p4)  ;;  %v2764_v62 = vld [vmem:[#allocation11 + $0x38] sm:$0xff] (!%p3362_p4) }
 0x204   : > { %3513 = vmatprep.subr.bf16.mxu0 (!%p3362_p4), %v3512_v11  ;;  %3545 = vmatprep.subr.bf16.mxu1 (!%p3362_p4), %v3544_v19  ;;  %v2566_v11 = vld [vmem:[#allocation8 + $0xf0] sm:$0xff] (!%p3362_p4)  ;;  %v3530_v20 = vpack.c.bf16 (!%p3362_p4), %v2549_v2, %v2548_v1 }
 0x205   : > { %v2766_v1 = vld [vmem:[#allocation11 + $0x48] sm:$0xff] (!%p3362_p4) }
 0x207   : > { %3515 = vmatpush3.bf16.msra.mxu0 (!%p3362_p4), %v3514_v18  ;;  %3547 = vmatpush3.bf16.msra.mxu1 (!%p3362_p4), %v3546_v27  ;;  %v2599_v18 = vld [vmem:[#allocation8 + $0x1f8] sm:$0xff] (!%p3362_p4) }
 0x208   : > { %3517 = vmatprep.subr.bf16.mxu0 (!%p3362_p4), %v3516_v28 }
 0x2d1   : > { %v2289_v31 = vpop.f32.mrb[0].mxu0  ;;  %v2461_v32 = vpop.f32.mrb[0].mxu1  ;;  %2489 = sbr.rel (%p3362_p4) target bundleno = 1282 (0x502), region = 111 }
 0x2d2   : > { %v2470_v35 = vadd.f32 %v2289_v31, %v534_v29  ;;  %v2472_v36 = vadd.f32 %v2461_v32, %v536_v30  ;;  %v2291_v37 = vpop.f32.mrb[1].mxu0  ;;  %v2463_v38 = vpop.f32.mrb[1].mxu1  ;;  %v2543_v29 = vld [vmem:[#allocation8 + $0x38] sm:$0xff] (!%p3362_p4)  ;;  %v2590_v30 = vld [vmem:[#allocation8 + $0x1b0] sm:$0xff] (!%p3362_p4) }
 0x2d3   : > { %v2471_v41 = vadd.f32 %v2291_v37, %v535_v23  ;;  %v2473_v25 = vadd.f32 %v2463_v38, %v537_v24  ;;  %v2293_v26 = vpop.f32.mrb[2].mxu0  ;;  %v2465_v42 = vpop.f32.mrb[2].mxu1  ;;  %v2591_v23 = vld [vmem:[#allocation8 + $0x1b8] sm:$0xff] (!%p3362_p4)  ;;  %v2574_v31 = vld [vmem:[#allocation8 + $0x130] sm:$0xff] (!%p3362_p4)  ;;  %v2592_v37 = vld [vmem:[#allocation8 + $0x1c0] sm:$0xff] (!%p3362_p4) }
 0x2d4   : > { %2478 = vst [vmem:[#allocation2] sm:$0xff] %v2470_v35  ;;  %2480 = vst [vmem:[#allocation2 + $0x10] sm:$0xff] %v2472_v36  ;;  %v2474_v43 = vadd.f32 %v2293_v26, %v538_v33  ;;  %v2476_v44 = vadd.f32 %v2465_v42, %v540_v34  ;;  %v2295_v45 = vpop.f32.mrb[3].mxu0  ;;  %v2467_v46 = vpop.f32.mrb[3].mxu1  ;;  %v3548_v24 = vpack.c.bf16 (!%p3362_p4), %v2591_v23, %v2590_v30  ;;  %v2575_v32 = vld [vmem:[#allocation8 + $0x138] sm:$0xff] (!%p3362_p4)  ;;  %v2560_v33 = vld [vmem:[#allocation8 + $0xc0] sm:$0xff] (!%p3362_p4)  ;;  %v2500_v34 = vlaneseq (!%p3362_p4) }
 0x2d5   : > { %2479 = vst [vmem:[#allocation2 + $0x8] sm:$0xff] %v2471_v41  ;;  %2481 = vst [vmem:[#allocation2 + $0x18] sm:$0xff] %v2473_v25  ;;  %v2475_v47 = vadd.f32 %v2295_v45, %v539_v39  ;;  %v2477_v48 = vadd.f32 %v2467_v46, %v541_v40  ;;  %v2561_v35 = vld [vmem:[#allocation8 + $0xc8] sm:$0xff] (!%p3362_p4)  ;;  %v3518_v36 = vpack.c.bf16 (!%p3362_p4), %v2543_v29, %v2542_v22  ;;  %v2544_v41 = vld [vmem:[#allocation8 + $0x40] sm:$0xff] (!%p3362_p4) }
 0x2d6   : > { %2482 = vst [vmem:[#allocation2 + $0x20] sm:$0xff] %v2474_v43  ;;  %2484 = vst [vmem:[#allocation2 + $0x30] sm:$0xff] %v2476_v44  ;;  %v2593_v38 = vld [vmem:[#allocation8 + $0x1c8] sm:$0xff] (!%p3362_p4)  ;;  %v3550_v39 = vpack.c.bf16 (!%p3362_p4), %v2575_v32, %v2574_v31  ;;  %v3520_v40 = vpack.c.bf16 (!%p3362_p4), %v2561_v35, %v2560_v33  ;;  %v2576_v26 = vld [vmem:[#allocation8 + $0x140] sm:$0xff] (!%p3362_p4)  ;;  %3549 = vmatprep.subr.bf16.mxu1 (!%p3362_p4), %v3548_v24  ;;  %v2501_v46 = vshrl.u32 (!%p3362_p4), %v2500_v34, 7 }
 0x2d7   : > { %2483 = vst [vmem:[#allocation2 + $0x28] sm:$0xff] %v2475_v47  ;;  %2485 = vst [vmem:[#allocation2 + $0x38] sm:$0xff] %v2477_v48  ;;  %v2545_v25 = vld [vmem:[#allocation8 + $0x48] sm:$0xff] (!%p3362_p4)  ;;  %v3552_v42 = vpack.c.bf16 (!%p3362_p4), %v2593_v38, %v2592_v37  ;;  %v2562_v44 = vld [vmem:[#allocation8 + $0xd0] sm:$0xff] (!%p3362_p4)  ;;  %3519 = vmatpush3.bf16.msra.mxu0 (!%p3362_p4), %v3518_v36  ;;  %v3562_v23 = vpack.c.bf16 (!%p3362_p4), %v2581_v7, %v2580_v3  ;;  %v3532_v24 = vpack.c.bf16 (!%p3362_p4), %v2567_v12, %v2566_v11 }
 0x2d8   : > { %v2577_v43 = vld [vmem:[#allocation8 + $0x148] sm:$0xff]  ;;  %v2563_v45 = vld [vmem:[#allocation8 + $0xd8] sm:$0xff]  ;;  %v2594_v47 = vld [vmem:[#allocation8 + $0x1d0] sm:$0xff]  ;;  %v3522_v49 = vpack.c.bf16 %v2545_v25, %v2544_v41  ;;  %3551 = vmatpush3.bf16.msra.mxu1 %v3550_v39  ;;  %3521 = vmatprep.subr.bf16.mxu0 %v3520_v40  ;;  %v2506_v59 = vsub.s32 1, %v2501_v46  ;;  %v2514_v60 = vsub.s32 3, %v2501_v46  ;;  %v2502_v63 = vsub.s32 0, %v2501_v46 }
 0x2d9   : > { %v2595_v48 = vld [vmem:[#allocation8 + $0x1d8] sm:$0xff]  ;;  %v3554_v50 = vpack.c.bf16 %v2577_v43, %v2576_v26  ;;  %v3524_v51 = vpack.c.bf16 %v2563_v45, %v2562_v44  ;;  %3553 = vmatprep.subr.bf16.mxu1 %v3552_v42  ;;  %v2510_v4 = vsub.s32 2, %v2501_v46  ;;  %v2582_v22 = vld [vmem:[#allocation8 + $0x170] sm:$0xff]  ;;  %v3564_v34 = vpack.c.bf16 %v2599_v18, %v2598_v17  ;;  %v2757_v38 = vld [vmem:[#allocation11] sm:$0xff] }
 0x2da   : > { %v3556_v55 = vpack.c.bf16 %v2595_v48, %v2594_v47  ;;  %v2507_v13 = vrot.slane %v2498_v9, %v2506_v59  ;;  %v2515_v15 = vrot.slane %v2498_v9, %v2514_v60  ;;  %v2503_v19 = vrot.slane %v2498_v9, %v2502_v63  ;;  %v2583_v31 = vld [vmem:[#allocation8 + $0x178] sm:$0xff]  ;;  %v2758_v39 = vld [vmem:[#allocation11 + $0x8] sm:$0xff] }
 0x2db   : > { %3523 = vmatpush3.bf16.msra.mxu0 %v3522_v49  ;;  %v2490_v28 = vld [vmem:[#allocation2] sm:$0xff]  ;;  %v2511_v30 = vrot.slane %v2498_v9, %v2510_v4  ;;  %v2492_v32 = vld [vmem:[#allocation2 + $0x10] sm:$0xff]  ;;  %v3534_v41 = vpack.c.bf16 %v2551_v21, %v2550_v16  ;;  %v3566_v43 = vpack.c.bf16 %v2583_v31, %v2582_v22  ;;  %v3568_v46 = vpack.c.bf16 %v2758_v39, %v2757_v38 }
 0x2dc   : > { %3555 = vmatpush3.bf16.msra.mxu1 %v3554_v50  ;;  %3525 = vmatprep.subr.bf16.mxu0 %v3524_v51  ;;  %v2491_v8 = vld [vmem:[#allocation2 + $0x8] sm:$0xff]  ;;  %v2493_v14 = vld [vmem:[#allocation2 + $0x18] sm:$0xff]  ;;  %v2520_v40 = vadd.f32 %v2503_v19, %v2490_v28  ;;  %v3576_v60 = vpack.c.bf16 %v2762_v58, %v2761_v57  ;;  %v3580_v63 = vpack.c.bf16 %v2764_v62, %v2763_v61 }
 0x2dd   : > { %3557 = vmatprep.subr.bf16.mxu1 %v3556_v55  ;;  %v2521_v27 = vadd.f32 %v2507_v13, %v2491_v8  ;;  %v2523_v29 = vadd.f32 %v2515_v15, %v2493_v14  ;;  %v2522_v25 = vadd.f32 %v2511_v30, %v2492_v32  ;;  %v2494_v42 = vld [vmem:[#allocation2 + $0x20] sm:$0xff]  ;;  %v2496_v45 = vld [vmem:[#allocation2 + $0x30] sm:$0xff] }
 0x2de   : > { %v2495_v33 = vld [vmem:[#allocation2 + $0x28] sm:$0xff]  ;;  %v2497_v37 = vld [vmem:[#allocation2 + $0x38] sm:$0xff]  ;;  %v2528_v47 = vmax.f32 %v2520_v40, 0.0  ;;  %v2524_v48 = vadd.f32 %v2503_v19, %v2494_v42  ;;  %v2526_v53 = vadd.f32 %v2511_v30, %v2496_v45 }
 0x2df   : > { %3527 = vmatpush3.bf16.msra.mxu0 %v3526_v0  ;;  %v2529_v35 = vmax.f32 %v2521_v27, 0.0  ;;  %v2531_v36 = vmax.f32 %v2523_v29, 0.0  ;;  %v2525_v26 = vadd.f32 %v2507_v13, %v2495_v33  ;;  %v2527_v44 = vadd.f32 %v2515_v15, %v2497_v37  ;;  %v2759_v49 = vld [vmem:[#allocation11 + $0x10] sm:$0xff]  ;;  %v2760_v50 = vld [vmem:[#allocation11 + $0x18] sm:$0xff]  ;;  %v2765_v0 = vld [vmem:[#allocation11 + $0x40] sm:$0xff] }
 0x2e0   : > { %3559 = vmatpush3.bf16.msra.mxu1 %v3558_v5  ;;  %3529 = vmatprep.subr.bf16.mxu0 %v3528_v6  ;;  %v2530_v51 = vmax.f32 %v2522_v25, 0.0  ;;  %v3572_v55 = vpack.c.bf16 %v2760_v50, %v2759_v49  ;;  %v2532_v56 = vmax.f32 %v2524_v48, 0.0  ;;  %v2534_v59 = vmax.f32 %v2526_v53, 0.0  ;;  %v2767_v3 = vld [vmem:[#allocation11 + $0x50] sm:$0xff]  ;;  %v2768_v4 = vld [vmem:[#allocation11 + $0x58] sm:$0xff]  ;;  %v2769_v6 = vld [vmem:[#allocation11 + $0x60] sm:$0xff] }
 0x2e1   : > { %3561 = vmatprep.subr.bf16.mxu1 %v3560_v10  ;;  %2671 = vmatprep.mubr.f32.mxu0 %v2529_v35  ;;  %v2533_v52 = vmax.f32 %v2525_v26, 0.0  ;;  %v2535_v54 = vmax.f32 %v2527_v44, 0.0  ;;  %v3584_v2 = vpack.c.bf16 %v2766_v1, %v2765_v0  ;;  %v3588_v5 = vpack.c.bf16 %v2768_v4, %v2767_v3  ;;  %v2770_v7 = vld [vmem:[#allocation11 + $0x68] sm:$0xff]  ;;  %v2771_v9 = vld [vmem:[#allocation11 + $0x70] sm:$0xff]  ;;  %v2772_v10 = vld [vmem:[#allocation11 + $0x78] sm:$0xff] }
 0x2e2   : > { %2746 = vmatprep.mubr.f32.mxu1 %v2531_v36  ;;  %v3592_v8 = vpack.c.bf16 %v2770_v7, %v2769_v6  ;;  %v3596_v11 = vpack.c.bf16 %v2772_v10, %v2771_v9  ;;  %v3363_v13 = vld [vmem:[#allocation9] ss:$0 sm:$0xff]  ;;  %v3365_v37 = vld [vmem:[#allocation14] ss:$0 sm:$0xff]  ;;  %v3364_v25 = vld [vmem:[#allocation12] ss:$0 sm:$0xff] }
 0x2e3   : > { %3531 = vmatpush3.bf16.msra.mxu0 %v3530_v20 }
 0x2e4   : > { %3563 = vmatpush3.bf16.msra.mxu1 %v3562_v23  ;;  %3533 = vmatprep.subr.bf16.mxu0 %v3532_v24 }
 0x2e5   : > { %3565 = vmatprep.subr.bf16.mxu1 %v3564_v34 }
 0x2e7   : > { %3535 = vmatpush3.bf16.msra.mxu0 %v3534_v41 }
 0x2e8   : > { %3567 = vmatpush3.bf16.msra.mxu1 %v3566_v43  ;;  %3569 = vmatprep.subr.bf16.mxu0 %v3568_v46 }
 0x2ea   : > { %2672 = vmatmul.mubr.f32.vlgmr.msra.gmra.mrb[0].mxu0 %v2528_v47 }
 0x2eb   : > { %2747 = vmatmul.mubr.f32.vlgmr.msra.gmra.mrb[0].mxu1 %v2530_v51  ;;  %2676 = vmatprep.mubr.f32.mxu0 %v2533_v52 }
 0x2ec   : > { %2751 = vmatprep.mubr.f32.mxu1 %v2535_v54  ;;  %3571 = vmatpush3.bf16.msra.mxu0 %v3568_v46 }
 0x2ed   : > { %3573 = vmatprep.subr.bf16.mxu0 %v3572_v55 }
 0x2ee   : > { %2677 = vmatmul.mubr.f32.gmra.mrb[2].mxu0 %v2532_v56 }
 0x2ef   : > { %2752 = vmatmul.mubr.f32.gmra.mrb[2].mxu1 %v2534_v59 }
 0x2f0   : > { %3575 = vmatpush3.bf16.msra.mxu0 %v3572_v55 }
 0x2f1   : > { %3577 = vmatprep.subr.bf16.mxu0 %v3576_v60 }
 0x2f4   : > { %3579 = vmatpush3.bf16.msra.mxu0 %v3576_v60 }
 0x2f5   : > { %3581 = vmatprep.subr.bf16.mxu0 %v3580_v63 }
 0x2f8   : > { %3583 = vmatpush3.bf16.msra.mxu0 %v3580_v63 }
 0x2f9   : > { %3585 = vmatprep.subr.bf16.mxu0 %v3584_v2 }
 0x2fc   : > { %3587 = vmatpush3.bf16.msra.mxu0 %v3584_v2 }
 0x2fd   : > { %3589 = vmatprep.subr.bf16.mxu0 %v3588_v5 }
 0x300   : > { %3591 = vmatpush3.bf16.msra.mxu0 %v3588_v5 }
 0x301   : > { %3593 = vmatprep.subr.bf16.mxu0 %v3592_v8 }
 0x304   : > { %3595 = vmatpush3.bf16.msra.mxu0 %v3592_v8 }
 0x305   : > { %3597 = vmatprep.subr.bf16.mxu0 %v3596_v11 }
 0x308   : > { %3599 = vmatpush3.bf16.msra.mxu0 %v3596_v11 }
 0x3bd   : > { %v3407_v12 = vpop.f32.mrb[0].mxu0 }
 0x3be   : > { %v3408_v14 = vpop.f32.mrb[1].mxu0  ;;  %v3445_v15 = vpop.f32.mrb[0].mxu1 }
 0x3bf   : > { %v3409_v16 = vadd.f32 %v3408_v14, %v3407_v12  ;;  %v3446_v17 = vpop.f32.mrb[1].mxu1 }
 0x3c0   : > { %v3447_v18 = vadd.f32 %v3446_v17, %v3445_v15 }
 0x3c1   : > { %v2674_v19 = vadd.f32 %v3409_v16, %v3363_v13  ;;  %v3410_v20 = vpop.f32.mrb[2].mxu0 }
 0x3c2   : > { %v3411_v21 = vpop.f32.mrb[3].mxu0  ;;  %v3448_v22 = vpop.f32.mrb[2].mxu1 }
 0x3c3   : > { %v2749_v27 = vadd.f32 %v3447_v18, %v2674_v19  ;;  %v3412_v28 = vadd.f32 %v3411_v21, %v3410_v20  ;;  %v3449_v29 = vpop.f32.mrb[3].mxu1 }
 0x3c4   : > { %v3450_v30 = vadd.f32 %v3449_v29, %v3448_v22 }
 0x3c5   : > { %v2679_v23 = vadd.f32 %v3412_v28, %v3363_v13  ;;  %2857 = vmax.xlane.f32.xlu0 %v2749_v27  ;;  %3501 = vmatprep.mubr.f32.mxu0 %v2749_v27 }
 0x3c7   : > { %v2754_v24 = vadd.f32 %v3450_v30, %v2679_v23 }
 0x3c9   : > { %2859 = vmax.xlane.f32.xlu0 %v2754_v24  ;;  %3502 = vmatmul.mubr.f32.vlgmr.msra.gmra.mrb[4].mxu0 %v2754_v24 }
 0x452   : > { %v2858_v31 = vpop.xlane.xlu0 %2857 }
 0x453   : > { %v2861_v32 = vsub.f32 %v2749_v27, %v2858_v31 }
 0x455   : > { %v2863_v33 = vmul.f32 1.442695, %v2861_v32 }
 0x456   : > { %v2860_v34 = vpop.xlane.xlu0 %2859 }
 0x457   : > { %4124 = vpow2.f32 %v2863_v33  ;;  %v2862_v35 = vsub.f32 %v2754_v24, %v2860_v34 }
 0x459   : > { %v2865_v36 = vmul.f32 1.442695, %v2862_v35 }
 0x45b   : > { %4126 = vpow2.f32 %v2865_v36 }
 0x461   : > { %v4125_v38 = vpop.eup %4124 }
 0x462   : > { %2880 = vadd.xlane.f32.xlu1 %v4125_v38  ;;  %v2874_v39 = vmul.f32 %v4125_v38, %v3365_v37 }
 0x464   : > { %2876 = vadd.xlane.f32.xlu0 %v2874_v39 }
 0x465   : > { %v4127_v40 = vpop.eup %4126 }
 0x466   : > { %2882 = vadd.xlane.f32.xlu1 %v4127_v40  ;;  %v2875_v41 = vmul.f32 %v4127_v40, %v3365_v37 }
 0x46a   : > { %2878 = vadd.xlane.f32.xlu1 %v2875_v41 }
 0x49c   : > { %v3503_v26 = vpop.f32.mrb[4].mxu0 }
 0x49d   : > { %v2852_v42 = vadd.f32 %v3503_v26, %v3364_v25  ;;  %v2846_v43 = vpop.f32.mrb[5].mxu0 }
 0x49e   : > { %v2847_v44 = vadd.f32 %v3364_v25, %v2846_v43 }
 0x49f   : > { %2856 = vst [vmem:[%s5075_s15 + $0x8] sm:$0xff] %v2852_v42 }
 0x4a0   : > { %2855 = vst [vmem:[%s5075_s15] sm:$0xff] %v2847_v44 }
 0x4ef   : > { %v2881_v45 = vpop.xlane.xlu1 %2880 }
 0x4f0   : > { %4128 = vrcp.f32 %v2881_v45 }
 0x4f1   : > { %v2877_v48 = vpop.xlane.xlu0 %2876 }
 0x4f3   : > { %v2883_v46 = vpop.xlane.xlu1 %2882 }
 0x4f4   : > { %4130 = vrcp.f32 %v2883_v46 }
 0x4f7   : > { %v2879_v51 = vpop.xlane.xlu1 %2878 }
 0x4fa   : > { %v4129_v47 = vpop.eup %4128 }
 0x4fb   : > { %v2886_v49 = vmul.f32 %v4129_v47, %v2877_v48 }
 0x4fd   : > { %2888 = vst [vmem:[%s5076_s4] sm:$0xff] %v2886_v49 }
 0x4fe   : > { %v4131_v50 = vpop.eup %4130 }
 0x4ff   : > { %v2887_v52 = vmul.f32 %v4131_v50, %v2879_v51 }
 0x501   : > { %2889 = vst [vmem:[%s5076_s4 + $0x8] sm:$0xff] %v2887_v52 }
 0x502 PF: > { %s26_s14 = sadd.s32 1, %s4390_s14   ;;  %s5077_s28 = sld [smem:[#allocation21_spill]] }
 0x503   : > { %p23_p6 = scmp.ge.s32.totalorder %s26_s14, 4   ;;  %s5078_s29 = sld [smem:[#allocation20_spill]] }
 0x504   : > { %s5079_s30 = smov %s4374_s10  ;;  %s5080_s10 = smov %s4378_s11 }
 0x505   : > { %s5082_s12 = smov %s4386_s13  ;;  %25 = sbr.rel (!%p23_p6) target bundleno = 13 (0xd), region = 167 }
 0x508   : > { %s5081_s11 = smov %s5077_s28 }
 0x509   : > { %s5083_s13 = smov %s5078_s29 }
 0x50c   :  { %2929 = vsyncpa [#allocation5], 1 }
 0x50d   :  { %2931 = vsyncpa [#allocation5 + $0x1], 1 }
 0x50e   :  { %2932 = vsyncpa [#allocation7], 1 }
 0x50f   :  { %2933 = vsyncpa [#allocation10], 1 }
 0x510   :  { %2934 = vsyncpa [#allocation13], 1 }

</bundles_post_ra>
